<compile_context>
chip_gen: v6e
topology: v6e:2x2x1
jax: 0.10.0
libtpu: 0.0.40
codegen_flags: <defaults>
</compile_context>

<pallas_src>
import functools

import numpy as np

import jax
import jax.numpy as jnp
from jax.experimental import pallas as pl
from jax.experimental.pallas import tpu as pltpu


_EPS = 1e-5
_VMEM_LIMIT_BYTES = 48 * 1024 * 1024    # explicit scoped-VMEM limit (fits v7x 64 MiB)
_TILE_BUDGET_BYTES = 20 * 1024 * 1024   # per-grid-step working set (double-buffered)


# ----------------------------------------------------------------------------
# Pallas kernels
# ----------------------------------------------------------------------------
def _conv_fused_kernel(*refs, instance_norm, relu, has_bias, has_skip):
    """Whole-image fused conv: out = [skip +] act(IN(W @ col [+ b])).

    col_ref : (1, K, HW)    bf16 im2col patches, HW on lanes
    w_ref   : (Cout, K)     bf16 transposed weights
    b_ref   : (Cout, 1)     f32  (only when instance_norm == False)
    skip_ref: (1, Cout, HW) f32  residual input (optional)
    o_ref   : (1, Cout, HW) f32
    """
    it = iter(refs)
    col_ref = next(it)
    w_ref = next(it)
    b_ref = next(it) if has_bias else None
    skip_ref = next(it) if has_skip else None
    o_ref = next(it)

    # MXU matmul, bf16 inputs, f32 accumulate; output lane-dense (HW on lanes).
    acc = jnp.dot(w_ref[...], col_ref[0], preferred_element_type=jnp.float32)
    if has_bias:
        acc = acc + b_ref[...]
    if instance_norm:
        # InstanceNorm2d: per-sample/per-channel stats over HW, biased variance,
        # eps=1e-5, no affine (PyTorch default).  One-pass stats; the conv bias
        # is skipped because mean-subtraction cancels it exactly.
        mean = jnp.mean(acc, axis=1, keepdims=True)
        var = jnp.mean(acc * acc, axis=1, keepdims=True) - mean * mean
        acc = (acc - mean) * jax.lax.rsqrt(var + _EPS)
    if relu:
        acc = jnp.maximum(acc, 0.0)
    if has_skip:
        acc = acc + skip_ref[0]
    o_ref[0] = acc


def _conv_tile_plain_kernel(col_ref, w_ref, b_ref, o_ref, *, relu):
    """HW-tiled conv without InstanceNorm: out tile = act(W @ col + b)."""
    acc = jnp.dot(w_ref[...], col_ref[0], preferred_element_type=jnp.float32)
    acc = acc + b_ref[...]
    if relu:
        acc = jnp.maximum(acc, 0.0)
    o_ref[0] = acc


def _conv_tile_stats_kernel(col_ref, w_ref, raw_ref, ssum_ref, ssq_ref):
    """HW-tiled conv with IN, pass 1: raw tile = W @ col, and accumulate
    per-image per-channel sum / sum-of-squares across HW tiles (ssum/ssq
    output blocks are revisited along the tile axis)."""
    acc = jnp.dot(w_ref[...], col_ref[0], preferred_element_type=jnp.float32)
    raw_ref[0] = acc

    @pl.when(pl.program_id(1) == 0)
    def _init():
        ssum_ref[...] = jnp.zeros_like(ssum_ref)
        ssq_ref[...] = jnp.zeros_like(ssq_ref)

    ssum_ref[0] += jnp.sum(acc, axis=1, keepdims=True)
    ssq_ref[0] += jnp.sum(acc * acc, axis=1, keepdims=True)


def _in_finalize_kernel(*refs, relu, has_skip, inv_hw):
    """HW-tiled conv with IN, pass 2: normalize with per-image stats,
    ReLU, optional fused residual add."""
    it = iter(refs)
    raw_ref = next(it)
    ssum_ref = next(it)
    ssq_ref = next(it)
    skip_ref = next(it) if has_skip else None
    o_ref = next(it)

    x = raw_ref[0]                          # (Cout, hw_tile) f32
    mean = ssum_ref[0] * inv_hw             # (Cout, 1)
    var = ssq_ref[0] * inv_hw - mean * mean
    y = (x - mean) * jax.lax.rsqrt(var + _EPS)
    if relu:
        y = jnp.maximum(y, 0.0)
    if has_skip:
        y = y + skip_ref[0]
    o_ref[0] = y


# ----------------------------------------------------------------------------
# Wrapper: one conv "layer" = [upsample] + reflection pad + conv + [IN] + [ReLU] [+ skip]
# ----------------------------------------------------------------------------
def _reflect_upsample_indices(src_size, scale, pad):
    """Static source indices implementing ReflectionPad(pad) o nearest-Upsample(scale)
    as a single gather (matches nn.Upsample(nearest) followed by ReflectionPad2d)."""
    out = src_size * scale
    idx = np.arange(out + 2 * pad) - pad
    idx = np.abs(idx)                             # reflect at the low edge
    idx = (out - 1) - np.abs((out - 1) - idx)     # reflect at the high edge
    return jnp.asarray(idx // scale, dtype=jnp.int32)


def _pick_hw_tile(hw, k, cout, max_tile_rows):
    """Largest HW tile (multiple of 128 dividing HW) within the VMEM budget.
    n_tiles == 1 selects the fully fused single-block kernel."""
    if max_tile_rows is None:
        # per-row footprint: bf16 col (x2 double buffer) + f32 raw/out (x2 each)
        per_row = 4 * k + 16 * cout
        max_tile_rows = max(128, (_TILE_BUDGET_BYTES // per_row) // 128 * 128)
    if hw <= max_tile_rows:
        return hw, 1
    tile = (min(max_tile_rows, hw) // 128) * 128
    while tile >= 128:
        if hw % tile == 0:
            return tile, hw // tile
        tile -= 128
    # HW larger than the budget but with no multiple-of-128 divisor: fall back
    # to the single-block fused kernel (rare for realistic image sizes).
    return hw, 1


def conv_layer(x, wb, *, instance_norm=True, relu=True, upsample=1,
               residual=None, max_tile_rows=None):
    """[nearest-Upsample(scale)] -> ReflectionPad(k//2) -> Conv2d(stride=1)
       -> [InstanceNorm2d] -> [ReLU] -> [+ residual]   (all NCHW).

    x        : (N, Cin, H, W) float32
    wb       : (w (KH, KW, Cin, Cout), b (Cout,))
    residual : optional (N, Cout, H_out, W_out) float32 added after the epilogue
    """
    w, b = wb
    n, cin, h_in, w_in = x.shape
    kh, kw, _, cout = w.shape
    pad = kh // 2
    h = h_in * upsample
    ww = w_in * upsample
    hw = h * ww
    k = kh * kw * cin

    # Fused nearest-upsample + reflection pad as one static gather.
    ridx = _reflect_upsample_indices(h_in, upsample, pad)
    cidx = _reflect_upsample_indices(w_in, upsample, pad)
    xp = jnp.take(jnp.take(x, ridx, axis=2), cidx, axis=3)   # (N, Cin, h+2p, ww+2p)

    # im2col in (K, HW) layout (tap-major / channel-minor, matching the weight
    # reshape below); cast to bf16 so the MXU runs native bf16 and the im2col
    # HBM->VMEM DMA bytes are halved.
    # TODO(synk): the materialized im2col still inflates HBM traffic by KH*KW;
    # an in-kernel halo-DMA im2col would remove it.
    taps = []
    for ih in range(kh):
        for iw in range(kw):
            taps.append(xp[:, :, ih:ih + h, iw:iw + ww])
    col = jnp.stack(taps, axis=1).reshape(n, k, hw).astype(jnp.bfloat16)

    wt = jnp.transpose(w.reshape(k, cout)).astype(jnp.bfloat16)   # (Cout, K)
    b2 = b.reshape(cout, 1).astype(jnp.float32)

    skip = None
    if residual is not None:
        skip = residual.reshape(n, cout, hw).astype(jnp.float32)

    hw_tile, n_tiles = _pick_hw_tile(hw, k, cout, max_tile_rows)

    # ---------------- fully fused single-tile path ----------------
    if n_tiles == 1:
        has_bias = not instance_norm            # bias is cancelled by IN
        kern = functools.partial(_conv_fused_kernel, instance_norm=instance_norm,
                                 relu=relu, has_bias=has_bias,
                                 has_skip=skip is not None)
        in_specs = [
            pl.BlockSpec((1, k, hw), lambda i: (i, 0, 0)),
            pl.BlockSpec((cout, k), lambda i: (0, 0)),
        ]
        inputs = [col, wt]
        if has_bias:
            in_specs.append(pl.BlockSpec((cout, 1), lambda i: (0, 0)))
            inputs.append(b2)
        if skip is not None:
            in_specs.append(pl.BlockSpec((1, cout, hw), lambda i: (i, 0, 0)))
            inputs.append(skip)
        out = pl.pallas_call(
            kern,
            out_shape=jax.ShapeDtypeStruct((n, cout, hw), jnp.float32),
            grid=(n,),
            in_specs=in_specs,
            out_specs=pl.BlockSpec((1, cout, hw), lambda i: (i, 0, 0)),
            compiler_params=pltpu.CompilerParams(
                dimension_semantics=("parallel",),
                vmem_limit_bytes=_VMEM_LIMIT_BYTES),
        )(*inputs)
        return out.reshape(n, cout, h, ww)

    # ---------------- HW-tiled path, no InstanceNorm ----------------
    if not instance_norm:
        out = pl.pallas_call(
            functools.partial(_conv_tile_plain_kernel, relu=relu),
            out_shape=jax.ShapeDtypeStruct((n, cout, hw), jnp.float32),
            grid=(n, n_tiles),
            in_specs=[
                pl.BlockSpec((1, k, hw_tile), lambda i, t: (i, 0, t)),
                pl.BlockSpec((cout, k), lambda i, t: (0, 0)),
                pl.BlockSpec((cout, 1), lambda i, t: (0, 0)),
            ],
            out_specs=pl.BlockSpec((1, cout, hw_tile), lambda i, t: (i, 0, t)),
            compiler_params=pltpu.CompilerParams(
                dimension_semantics=("parallel", "parallel"),
                vmem_limit_bytes=_VMEM_LIMIT_BYTES),
        )(col, wt, b2)
        if skip is not None:                    # not used by this network
            out = out + skip
        return out.reshape(n, cout, h, ww)

    # ---------------- HW-tiled path with InstanceNorm (two passes) ----------------
    # Pass 1: streaming GEMM tiles + per-image channel sum / sum-of-squares.
    raw, ssum, ssq = pl.pallas_call(
        _conv_tile_stats_kernel,
        out_shape=(
            jax.ShapeDtypeStruct((n, cout, hw), jnp.float32),
            jax.ShapeDtypeStruct((n, cout, 1), jnp.float32),
            jax.ShapeDtypeStruct((n, cout, 1), jnp.float32),
        ),
        grid=(n, n_tiles),
        in_specs=[
            pl.BlockSpec((1, k, hw_tile), lambda i, t: (i, 0, t)),
            pl.BlockSpec((cout, k), lambda i, t: (0, 0)),
        ],
        out_specs=(
            pl.BlockSpec((1, cout, hw_tile), lambda i, t: (i, 0, t)),
            pl.BlockSpec((1, cout, 1), lambda i, t: (i, 0, 0)),
            pl.BlockSpec((1, cout, 1), lambda i, t: (i, 0, 0)),
        ),
        compiler_params=pltpu.CompilerParams(
            dimension_semantics=("parallel", "arbitrary"),
            vmem_limit_bytes=_VMEM_LIMIT_BYTES),
    )(col, wt)

    # Pass 2: normalize with per-image stats, ReLU, optional fused residual add.
    kern = functools.partial(_in_finalize_kernel, relu=relu,
                             has_skip=skip is not None, inv_hw=1.0 / float(hw))
    in_specs = [
        pl.BlockSpec((1, cout, hw_tile), lambda i, t: (i, 0, t)),
        pl.BlockSpec((1, cout, 1), lambda i, t: (i, 0, 0)),
        pl.BlockSpec((1, cout, 1), lambda i, t: (i, 0, 0)),
    ]
    inputs = [raw, ssum, ssq]
    if skip is not None:
        in_specs.append(pl.BlockSpec((1, cout, hw_tile), lambda i, t: (i, 0, t)))
        inputs.append(skip)
    out = pl.pallas_call(
        kern,
        out_shape=jax.ShapeDtypeStruct((n, cout, hw), jnp.float32),
        grid=(n, n_tiles),
        in_specs=in_specs,
        out_specs=pl.BlockSpec((1, cout, hw_tile), lambda i, t: (i, 0, t)),
        compiler_params=pltpu.CompilerParams(
            dimension_semantics=("parallel", "parallel"),
            vmem_limit_bytes=_VMEM_LIMIT_BYTES),
    )(*inputs)
    return out.reshape(n, cout, h, ww)


# ----------------------------------------------------------------------------
# Plain-JAX glue (pure data movement)
# ----------------------------------------------------------------------------
def maxpool2(x):
    # MaxPool2d(kernel_size=2, stride=2), NCHW
    n, c, h, w = x.shape
    return x.reshape(n, c, h // 2, 2, w // 2, 2).max(axis=(3, 5))


def bilinear_resize(x, out_h, out_w):
    # F.interpolate(mode='bilinear', align_corners=False), NCHW.
    # Identity when sizes match (always the case for inputs divisible by 4).
    n, c, h, w = x.shape
    if out_h == h and out_w == w:
        return x
    ys = (jnp.arange(out_h, dtype=jnp.float32) + 0.5) * (h / out_h) - 0.5
    xs = (jnp.arange(out_w, dtype=jnp.float32) + 0.5) * (w / out_w) - 0.5
    y0f = jnp.floor(ys)
    x0f = jnp.floor(xs)
    wy = (ys - y0f)[None, None, :, None]
    wx = (xs - x0f)[None, None, None, :]
    y0i = y0f.astype(jnp.int32)
    x0i = x0f.astype(jnp.int32)
    y0 = jnp.clip(y0i, 0, h - 1)
    y1 = jnp.clip(y0i + 1, 0, h - 1)
    x0 = jnp.clip(x0i, 0, w - 1)
    x1 = jnp.clip(x0i + 1, 0, w - 1)

    def g(yi, xi):
        return x[:, :, yi][:, :, :, xi]

    top = g(y0, x0) * (1.0 - wx) + g(y0, x1) * wx
    bot = g(y1, x0) * (1.0 - wx) + g(y1, x1) * wx
    return top * (1.0 - wy) + bot * wy


# ----------------------------------------------------------------------------
# Parameter init (deterministic, shapes implied by TransformNet.__init__)
# ----------------------------------------------------------------------------
def init_params(key, base=8):
    shapes = [
        ("d1", 9, 3, base),             # ConvLayer(3, base, k=9, trainable)
        ("d2", 3, base, base * 2),      # ConvLayer(base, 2*base, k=3)
        ("d3", 3, base * 2, base * 4),  # ConvLayer(2*base, 4*base, k=3)
    ]
    for i in range(5):                  # 5 residual blocks, 2 convs each
        shapes.append((f"r{i}a", 3, base * 4, base * 4))
        shapes.append((f"r{i}b", 3, base * 4, base * 4))
    shapes += [
        ("u1", 3, base * 4, base * 2),  # ConvLayer(4*base, 2*base, k=3, upsample=2)
        ("u2", 3, base * 2, base),      # ConvLayer(2*base, base, k=3, upsample=2)
        ("u3", 9, base, 3),             # ConvLayer(base, 3, k=9, no IN, no ReLU)
    ]
    params = {}
    for name, k, cin, cout in shapes:
        key, kw_key, kb_key = jax.random.split(key, 3)
        fan_in = float(k * k * cin)
        w = jax.random.normal(kw_key, (k, k, cin, cout), jnp.float32) / jnp.sqrt(fan_in)
        b = 0.01 * jax.random.normal(kb_key, (cout,), jnp.float32)
        params[name] = (w, b)
    return params


# ----------------------------------------------------------------------------
# Forward pass (mirrors TransformNet.forward)
# ----------------------------------------------------------------------------
def transform_net_forward(x_nchw, params):
    x = x_nchw.astype(jnp.float32)
    orig_h, orig_w = x.shape[2], x.shape[3]

    # downsampling
    y = conv_layer(x, params["d1"])
    y = conv_layer(y, params["d2"])
    y = maxpool2(y)
    y = conv_layer(y, params["d3"])
    y = maxpool2(y)

    # residual blocks: conv(IN, ReLU) -> conv(IN) -> + input
    # (the skip-add is fused into the second conv's kernel)
    for i in range(5):
        r = conv_layer(y, params[f"r{i}a"])
        y = conv_layer(r, params[f"r{i}b"], relu=False, residual=y)

    # upsampling (nearest x2 fused into each conv's pad/im2col gather)
    y = conv_layer(y, params["u1"], upsample=2)
    y = conv_layer(y, params["u2"], upsample=2)
    y = conv_layer(y, params["u3"], instance_norm=False, relu=False)

    # F.interpolate(..., mode='bilinear', align_corners=False)
    y = bilinear_resize(y, orig_h, orig_w)
    return y


if __name__ == "__main__":
    key = jax.random.PRNGKey(0)
    pkey, xkey, ckey = jax.random.split(key, 3)

    base = 8
    params = init_params(pkey, base=base)

    # NCHW input (RGB image), small shape consistent with the module.
    x = jax.random.normal(xkey, (2, 3, 16, 16), jnp.float32)

    fwd = jax.jit(transform_net_forward)
    y = fwd(x, params)
    jax.block_until_ready(y)
    assert y.shape == (2, 3, 16, 16), y.shape
    assert jnp.all(jnp.isfinite(y))

    # Exercise the HW-tiled two-pass InstanceNorm path (used for realistic
    # image sizes) and check it matches the fused single-tile path.
    xt = jax.random.normal(ckey, (1, base, 16, 16), jnp.float32)      # HW = 256
    a = conv_layer(xt, params["d2"])                                   # fused
    bq = conv_layer(xt, params["d2"], max_tile_rows=128)               # 2 HW tiles
    assert jnp.allclose(a, bq, atol=1e-2, rtol=1e-2)

    # Tiled path with the fused residual skip-add.
    x4 = jax.random.normal(jax.random.PRNGKey(7), (1, 4 * base, 16, 16), jnp.float32)
    skip = jax.random.normal(jax.random.PRNGKey(8), (1, 4 * base, 16, 16), jnp.float32)
    a = conv_layer(x4, params["r0b"], relu=False, residual=skip)
    bq = conv_layer(x4, params["r0b"], relu=False, residual=skip, max_tile_rows=128)
    assert jnp.allclose(a, bq, atol=1e-2, rtol=1e-2)

    # Tiled path without InstanceNorm (final-layer style).
    a = conv_layer(xt, params["u3"], instance_norm=False, relu=False)
    bq = conv_layer(xt, params["u3"], instance_norm=False, relu=False, max_tile_rows=128)
    assert jnp.allclose(a, bq, atol=1e-2, rtol=1e-2)

    print("KERNEL_OK")
</pallas_src>

<mosaic_0001>
module attributes {stable_mosaic.version = 11 : i64} {
  func.func @_conv_fused_kernel(%arg0: i32, %arg1: memref<1x243x256xbf16, #tpu.memory_space<vmem>>, %arg2: memref<8x243xbf16, #tpu.memory_space<vmem>>, %arg3: memref<1x8x256xf32, #tpu.memory_space<vmem>>) attributes {dimension_semantics = [#tpu.dimension_semantics<parallel>], iteration_bounds = array<i64: 2>, scalar_prefetch = 0 : i64, scratch_operands = 0 : i64, tpu.core_type = #tpu.core_type<tc>, window_params = [{transform_indices = @transform_0, window_bounds = array<i64: 1, 243, 256>}, {pipeline_mode = #tpu.pipeline_mode<synchronous>, transform_indices = @transform_1, window_bounds = array<i64: 8, 243>}, {transform_indices = @transform_2, window_bounds = array<i64: 1, 8, 256>}]} {
    %c0 = arith.constant 0 : index
    %c0_0 = arith.constant 0 : index
    %0 = vector.load %arg2[%c0, %c0_0] : memref<8x243xbf16, #tpu.memory_space<vmem>>, vector<8x243xbf16>
    %c0_1 = arith.constant 0 : index
    %c0_2 = arith.constant 0 : index
    %c0_3 = arith.constant 0 : index
    %1 = vector.load %arg1[%c0_1, %c0_2, %c0_3] : memref<1x243x256xbf16, #tpu.memory_space<vmem>>, vector<1x243x256xbf16>
    %2 = vector.shape_cast %1 : vector<1x243x256xbf16> to vector<243x256xbf16>
    %cst = arith.constant dense<0.000000e+00> : vector<8x256xf32>
    %3 = tpu.matmul %0, %2, %cst {dimension_numbers = #tpu.dot_dimension_numbers<[1], [0], [0], [1], [0, 0, 1, 1], [], []>} : vector<8x243xbf16>, vector<243x256xbf16>, vector<8x256xf32> -> vector<8x256xf32>
    %cst_4 = arith.constant dense<0.000000e+00> : vector<8xf32>
    %4 = vector.multi_reduction <add>, %3, %cst_4 [1] : vector<8x256xf32> to vector<8xf32>
    %5 = vector.shape_cast %4 : vector<8xf32> to vector<8x1xf32>
    %cst_5 = arith.constant 2.560000e+02 : f32
    %6 = vector.broadcast %cst_5 : f32 to vector<8x1xf32>
    %7 = arith.divf %5, %6 : vector<8x1xf32>
    %8 = arith.mulf %3, %3 : vector<8x256xf32>
    %cst_6 = arith.constant dense<0.000000e+00> : vector<8xf32>
    %9 = vector.multi_reduction <add>, %8, %cst_6 [1] : vector<8x256xf32> to vector<8xf32>
    %10 = vector.shape_cast %9 : vector<8xf32> to vector<8x1xf32>
    %cst_7 = arith.constant 2.560000e+02 : f32
    %11 = vector.broadcast %cst_7 : f32 to vector<8x1xf32>
    %12 = arith.divf %10, %11 : vector<8x1xf32>
    %13 = arith.mulf %7, %7 : vector<8x1xf32>
    %14 = arith.subf %12, %13 : vector<8x1xf32>
    %15 = vector.broadcast %7 : vector<8x1xf32> to vector<8x256xf32>
    %16 = arith.subf %3, %15 : vector<8x256xf32>
    %cst_8 = arith.constant 9.99999974E-6 : f32
    %17 = vector.broadcast %cst_8 : f32 to vector<8x1xf32>
    %18 = arith.addf %14, %17 : vector<8x1xf32>
    %19 = math.rsqrt %18 : vector<8x1xf32>
    %20 = vector.broadcast %19 : vector<8x1xf32> to vector<8x256xf32>
    %21 = arith.mulf %16, %20 : vector<8x256xf32>
    %cst_9 = arith.constant 0.000000e+00 : f32
    %22 = vector.broadcast %cst_9 : f32 to vector<8x256xf32>
    %23 = arith.maximumf %21, %22 : vector<8x256xf32>
    %c0_10 = arith.constant 0 : index
    %c0_11 = arith.constant 0 : index
    %c0_12 = arith.constant 0 : index
    %24 = vector.load %arg3[%c0_10, %c0_11, %c0_12] : memref<1x8x256xf32, #tpu.memory_space<vmem>>, vector<1x8x256xf32>
    %25 = vector.shape_cast %24 : vector<1x8x256xf32> to vector<8x256xf32>
    %26 = vector.shape_cast %23 : vector<8x256xf32> to vector<1x8x256xf32>
    tpu.vector_store %arg3[%c0_10, %c0_11, %c0_12], %26 {strides = array<i32>} : memref<1x8x256xf32, #tpu.memory_space<vmem>>, vector<1x8x256xf32>,
    return
  }
  func.func @transform_0(%arg0: i32) -> (i32, i32, i32) {
    %c0_i32 = arith.constant 0 : i32
    %c0_i32_0 = arith.constant 0 : i32
    %c0_i32_1 = arith.constant 0 : i32
    return %arg0, %c0_i32, %c0_i32_0 : i32, i32, i32
  }
  func.func @transform_1(%arg0: i32) -> (i32, i32) {
    %c0_i32 = arith.constant 0 : i32
    %c0_i32_0 = arith.constant 0 : i32
    %c0_i32_1 = arith.constant 0 : i32
    return %c0_i32, %c0_i32_0 : i32, i32
  }
  func.func @transform_2(%arg0: i32) -> (i32, i32, i32) {
    %c0_i32 = arith.constant 0 : i32
    %c0_i32_0 = arith.constant 0 : i32
    %c0_i32_1 = arith.constant 0 : i32
    return %arg0, %c0_i32, %c0_i32_0 : i32, i32, i32
  }
}

module attributes {stable_mosaic.version = 11 : i64} {
  func.func @_conv_fused_kernel(%arg0: i32, %arg1: memref<1x72x256xbf16, #tpu.memory_space<vmem>>, %arg2: memref<16x72xbf16, #tpu.memory_space<vmem>>, %arg3: memref<1x16x256xf32, #tpu.memory_space<vmem>>) attributes {dimension_semantics = [#tpu.dimension_semantics<parallel>], iteration_bounds = array<i64: 2>, scalar_prefetch = 0 : i64, scratch_operands = 0 : i64, tpu.core_type = #tpu.core_type<tc>, window_params = [{transform_indices = @transform_0, window_bounds = array<i64: 1, 72, 256>}, {pipeline_mode = #tpu.pipeline_mode<synchronous>, transform_indices = @transform_1, window_bounds = array<i64: 16, 72>}, {transform_indices = @transform_2, window_bounds = array<i64: 1, 16, 256>}]} {
    %c0 = arith.constant 0 : index
    %c0_0 = arith.constant 0 : index
    %0 = vector.load %arg2[%c0, %c0_0] : memref<16x72xbf16, #tpu.memory_space<vmem>>, vector<16x72xbf16>
    %c0_1 = arith.constant 0 : index
    %c0_2 = arith.constant 0 : index
    %c0_3 = arith.constant 0 : index
    %1 = vector.load %arg1[%c0_1, %c0_2, %c0_3] : memref<1x72x256xbf16, #tpu.memory_space<vmem>>, vector<1x72x256xbf16>
    %2 = vector.shape_cast %1 : vector<1x72x256xbf16> to vector<72x256xbf16>
    %cst = arith.constant dense<0.000000e+00> : vector<16x256xf32>
    %3 = tpu.matmul %0, %2, %cst {dimension_numbers = #tpu.dot_dimension_numbers<[1], [0], [0], [1], [0, 0, 1, 1], [], []>} : vector<16x72xbf16>, vector<72x256xbf16>, vector<16x256xf32> -> vector<16x256xf32>
    %cst_4 = arith.constant dense<0.000000e+00> : vector<16xf32>
    %4 = vector.multi_reduction <add>, %3, %cst_4 [1] : vector<16x256xf32> to vector<16xf32>
    %5 = vector.shape_cast %4 : vector<16xf32> to vector<16x1xf32>
    %cst_5 = arith.constant 2.560000e+02 : f32
    %6 = vector.broadcast %cst_5 : f32 to vector<16x1xf32>
    %7 = arith.divf %5, %6 : vector<16x1xf32>
    %8 = arith.mulf %3, %3 : vector<16x256xf32>
    %cst_6 = arith.constant dense<0.000000e+00> : vector<16xf32>
    %9 = vector.multi_reduction <add>, %8, %cst_6 [1] : vector<16x256xf32> to vector<16xf32>
    %10 = vector.shape_cast %9 : vector<16xf32> to vector<16x1xf32>
    %cst_7 = arith.constant 2.560000e+02 : f32
    %11 = vector.broadcast %cst_7 : f32 to vector<16x1xf32>
    %12 = arith.divf %10, %11 : vector<16x1xf32>
    %13 = arith.mulf %7, %7 : vector<16x1xf32>
    %14 = arith.subf %12, %13 : vector<16x1xf32>
    %15 = vector.broadcast %7 : vector<16x1xf32> to vector<16x256xf32>
    %16 = arith.subf %3, %15 : vector<16x256xf32>
    %cst_8 = arith.constant 9.99999974E-6 : f32
    %17 = vector.broadcast %cst_8 : f32 to vector<16x1xf32>
    %18 = arith.addf %14, %17 : vector<16x1xf32>
    %19 = math.rsqrt %18 : vector<16x1xf32>
    %20 = vector.broadcast %19 : vector<16x1xf32> to vector<16x256xf32>
    %21 = arith.mulf %16, %20 : vector<16x256xf32>
    %cst_9 = arith.constant 0.000000e+00 : f32
    %22 = vector.broadcast %cst_9 : f32 to vector<16x256xf32>
    %23 = arith.maximumf %21, %22 : vector<16x256xf32>
    %c0_10 = arith.constant 0 : index
    %c0_11 = arith.constant 0 : index
    %c0_12 = arith.constant 0 : index
    %24 = vector.load %arg3[%c0_10, %c0_11, %c0_12] : memref<1x16x256xf32, #tpu.memory_space<vmem>>, vector<1x16x256xf32>
    %25 = vector.shape_cast %24 : vector<1x16x256xf32> to vector<16x256xf32>
    %26 = vector.shape_cast %23 : vector<16x256xf32> to vector<1x16x256xf32>
    tpu.vector_store %arg3[%c0_10, %c0_11, %c0_12], %26 {strides = array<i32>} : memref<1x16x256xf32, #tpu.memory_space<vmem>>, vector<1x16x256xf32>,
    return
  }
  func.func @transform_0(%arg0: i32) -> (i32, i32, i32) {
    %c0_i32 = arith.constant 0 : i32
    %c0_i32_0 = arith.constant 0 : i32
    %c0_i32_1 = arith.constant 0 : i32
    return %arg0, %c0_i32, %c0_i32_0 : i32, i32, i32
  }
  func.func @transform_1(%arg0: i32) -> (i32, i32) {
    %c0_i32 = arith.constant 0 : i32
    %c0_i32_0 = arith.constant 0 : i32
    %c0_i32_1 = arith.constant 0 : i32
    return %c0_i32, %c0_i32_0 : i32, i32
  }
  func.func @transform_2(%arg0: i32) -> (i32, i32, i32) {
    %c0_i32 = arith.constant 0 : i32
    %c0_i32_0 = arith.constant 0 : i32
    %c0_i32_1 = arith.constant 0 : i32
    return %arg0, %c0_i32, %c0_i32_0 : i32, i32, i32
  }
}

module attributes {stable_mosaic.version = 11 : i64} {
  func.func @_conv_fused_kernel(%arg0: i32, %arg1: memref<1x144x64xbf16, #tpu.memory_space<vmem>>, %arg2: memref<32x144xbf16, #tpu.memory_space<vmem>>, %arg3: memref<1x32x64xf32, #tpu.memory_space<vmem>>) attributes {dimension_semantics = [#tpu.dimension_semantics<parallel>], iteration_bounds = array<i64: 2>, scalar_prefetch = 0 : i64, scratch_operands = 0 : i64, tpu.core_type = #tpu.core_type<tc>, window_params = [{transform_indices = @transform_0, window_bounds = array<i64: 1, 144, 64>}, {pipeline_mode = #tpu.pipeline_mode<synchronous>, transform_indices = @transform_1, window_bounds = array<i64: 32, 144>}, {transform_indices = @transform_2, window_bounds = array<i64: 1, 32, 64>}]} {
    %c0 = arith.constant 0 : index
    %c0_0 = arith.constant 0 : index
    %0 = vector.load %arg2[%c0, %c0_0] : memref<32x144xbf16, #tpu.memory_space<vmem>>, vector<32x144xbf16>
    %c0_1 = arith.constant 0 : index
    %c0_2 = arith.constant 0 : index
    %c0_3 = arith.constant 0 : index
    %1 = vector.load %arg1[%c0_1, %c0_2, %c0_3] : memref<1x144x64xbf16, #tpu.memory_space<vmem>>, vector<1x144x64xbf16>
    %2 = vector.shape_cast %1 : vector<1x144x64xbf16> to vector<144x64xbf16>
    %cst = arith.constant dense<0.000000e+00> : vector<32x64xf32>
    %3 = tpu.matmul %0, %2, %cst {dimension_numbers = #tpu.dot_dimension_numbers<[1], [0], [0], [1], [0, 0, 1, 1], [], []>} : vector<32x144xbf16>, vector<144x64xbf16>, vector<32x64xf32> -> vector<32x64xf32>
    %cst_4 = arith.constant dense<0.000000e+00> : vector<32xf32>
    %4 = vector.multi_reduction <add>, %3, %cst_4 [1] : vector<32x64xf32> to vector<32xf32>
    %5 = vector.shape_cast %4 : vector<32xf32> to vector<32x1xf32>
    %cst_5 = arith.constant 6.400000e+01 : f32
    %6 = vector.broadcast %cst_5 : f32 to vector<32x1xf32>
    %7 = arith.divf %5, %6 : vector<32x1xf32>
    %8 = arith.mulf %3, %3 : vector<32x64xf32>
    %cst_6 = arith.constant dense<0.000000e+00> : vector<32xf32>
    %9 = vector.multi_reduction <add>, %8, %cst_6 [1] : vector<32x64xf32> to vector<32xf32>
    %10 = vector.shape_cast %9 : vector<32xf32> to vector<32x1xf32>
    %cst_7 = arith.constant 6.400000e+01 : f32
    %11 = vector.broadcast %cst_7 : f32 to vector<32x1xf32>
    %12 = arith.divf %10, %11 : vector<32x1xf32>
    %13 = arith.mulf %7, %7 : vector<32x1xf32>
    %14 = arith.subf %12, %13 : vector<32x1xf32>
    %15 = vector.broadcast %7 : vector<32x1xf32> to vector<32x64xf32>
    %16 = arith.subf %3, %15 : vector<32x64xf32>
    %cst_8 = arith.constant 9.99999974E-6 : f32
    %17 = vector.broadcast %cst_8 : f32 to vector<32x1xf32>
    %18 = arith.addf %14, %17 : vector<32x1xf32>
    %19 = math.rsqrt %18 : vector<32x1xf32>
    %20 = vector.broadcast %19 : vector<32x1xf32> to vector<32x64xf32>
    %21 = arith.mulf %16, %20 : vector<32x64xf32>
    %cst_9 = arith.constant 0.000000e+00 : f32
    %22 = vector.broadcast %cst_9 : f32 to vector<32x64xf32>
    %23 = arith.maximumf %21, %22 : vector<32x64xf32>
    %c0_10 = arith.constant 0 : index
    %c0_11 = arith.constant 0 : index
    %c0_12 = arith.constant 0 : index
    %24 = vector.load %arg3[%c0_10, %c0_11, %c0_12] : memref<1x32x64xf32, #tpu.memory_space<vmem>>, vector<1x32x64xf32>
    %25 = vector.shape_cast %24 : vector<1x32x64xf32> to vector<32x64xf32>
    %26 = vector.shape_cast %23 : vector<32x64xf32> to vector<1x32x64xf32>
    tpu.vector_store %arg3[%c0_10, %c0_11, %c0_12], %26 {strides = array<i32>} : memref<1x32x64xf32, #tpu.memory_space<vmem>>, vector<1x32x64xf32>,
    return
  }
  func.func @transform_0(%arg0: i32) -> (i32, i32, i32) {
    %c0_i32 = arith.constant 0 : i32
    %c0_i32_0 = arith.constant 0 : i32
    %c0_i32_1 = arith.constant 0 : i32
    return %arg0, %c0_i32, %c0_i32_0 : i32, i32, i32
  }
  func.func @transform_1(%arg0: i32) -> (i32, i32) {
    %c0_i32 = arith.constant 0 : i32
    %c0_i32_0 = arith.constant 0 : i32
    %c0_i32_1 = arith.constant 0 : i32
    return %c0_i32, %c0_i32_0 : i32, i32
  }
  func.func @transform_2(%arg0: i32) -> (i32, i32, i32) {
    %c0_i32 = arith.constant 0 : i32
    %c0_i32_0 = arith.constant 0 : i32
    %c0_i32_1 = arith.constant 0 : i32
    return %arg0, %c0_i32, %c0_i32_0 : i32, i32, i32
  }
}

module attributes {stable_mosaic.version = 11 : i64} {
  func.func @_conv_fused_kernel(%arg0: i32, %arg1: memref<1x288x16xbf16, #tpu.memory_space<vmem>>, %arg2: memref<32x288xbf16, #tpu.memory_space<vmem>>, %arg3: memref<1x32x16xf32, #tpu.memory_space<vmem>>) attributes {dimension_semantics = [#tpu.dimension_semantics<parallel>], iteration_bounds = array<i64: 2>, scalar_prefetch = 0 : i64, scratch_operands = 0 : i64, tpu.core_type = #tpu.core_type<tc>, window_params = [{transform_indices = @transform_0, window_bounds = array<i64: 1, 288, 16>}, {pipeline_mode = #tpu.pipeline_mode<synchronous>, transform_indices = @transform_1, window_bounds = array<i64: 32, 288>}, {transform_indices = @transform_2, window_bounds = array<i64: 1, 32, 16>}]} {
    %c0 = arith.constant 0 : index
    %c0_0 = arith.constant 0 : index
    %0 = vector.load %arg2[%c0, %c0_0] : memref<32x288xbf16, #tpu.memory_space<vmem>>, vector<32x288xbf16>
    %c0_1 = arith.constant 0 : index
    %c0_2 = arith.constant 0 : index
    %c0_3 = arith.constant 0 : index
    %1 = vector.load %arg1[%c0_1, %c0_2, %c0_3] : memref<1x288x16xbf16, #tpu.memory_space<vmem>>, vector<1x288x16xbf16>
    %2 = vector.shape_cast %1 : vector<1x288x16xbf16> to vector<288x16xbf16>
    %cst = arith.constant dense<0.000000e+00> : vector<32x16xf32>
    %3 = tpu.matmul %0, %2, %cst {dimension_numbers = #tpu.dot_dimension_numbers<[1], [0], [0], [1], [0, 0, 1, 1], [], []>} : vector<32x288xbf16>, vector<288x16xbf16>, vector<32x16xf32> -> vector<32x16xf32>
    %cst_4 = arith.constant dense<0.000000e+00> : vector<32xf32>
    %4 = vector.multi_reduction <add>, %3, %cst_4 [1] : vector<32x16xf32> to vector<32xf32>
    %5 = vector.shape_cast %4 : vector<32xf32> to vector<32x1xf32>
    %cst_5 = arith.constant 1.600000e+01 : f32
    %6 = vector.broadcast %cst_5 : f32 to vector<32x1xf32>
    %7 = arith.divf %5, %6 : vector<32x1xf32>
    %8 = arith.mulf %3, %3 : vector<32x16xf32>
    %cst_6 = arith.constant dense<0.000000e+00> : vector<32xf32>
    %9 = vector.multi_reduction <add>, %8, %cst_6 [1] : vector<32x16xf32> to vector<32xf32>
    %10 = vector.shape_cast %9 : vector<32xf32> to vector<32x1xf32>
    %cst_7 = arith.constant 1.600000e+01 : f32
    %11 = vector.broadcast %cst_7 : f32 to vector<32x1xf32>
    %12 = arith.divf %10, %11 : vector<32x1xf32>
    %13 = arith.mulf %7, %7 : vector<32x1xf32>
    %14 = arith.subf %12, %13 : vector<32x1xf32>
    %15 = vector.broadcast %7 : vector<32x1xf32> to vector<32x16xf32>
    %16 = arith.subf %3, %15 : vector<32x16xf32>
    %cst_8 = arith.constant 9.99999974E-6 : f32
    %17 = vector.broadcast %cst_8 : f32 to vector<32x1xf32>
    %18 = arith.addf %14, %17 : vector<32x1xf32>
    %19 = math.rsqrt %18 : vector<32x1xf32>
    %20 = vector.broadcast %19 : vector<32x1xf32> to vector<32x16xf32>
    %21 = arith.mulf %16, %20 : vector<32x16xf32>
    %cst_9 = arith.constant 0.000000e+00 : f32
    %22 = vector.broadcast %cst_9 : f32 to vector<32x16xf32>
    %23 = arith.maximumf %21, %22 : vector<32x16xf32>
    %c0_10 = arith.constant 0 : index
    %c0_11 = arith.constant 0 : index
    %c0_12 = arith.constant 0 : index
    %24 = vector.load %arg3[%c0_10, %c0_11, %c0_12] : memref<1x32x16xf32, #tpu.memory_space<vmem>>, vector<1x32x16xf32>
    %25 = vector.shape_cast %24 : vector<1x32x16xf32> to vector<32x16xf32>
    %26 = vector.shape_cast %23 : vector<32x16xf32> to vector<1x32x16xf32>
    tpu.vector_store %arg3[%c0_10, %c0_11, %c0_12], %26 {strides = array<i32>} : memref<1x32x16xf32, #tpu.memory_space<vmem>>, vector<1x32x16xf32>,
    return
  }
  func.func @transform_0(%arg0: i32) -> (i32, i32, i32) {
    %c0_i32 = arith.constant 0 : i32
    %c0_i32_0 = arith.constant 0 : i32
    %c0_i32_1 = arith.constant 0 : i32
    return %arg0, %c0_i32, %c0_i32_0 : i32, i32, i32
  }
  func.func @transform_1(%arg0: i32) -> (i32, i32) {
    %c0_i32 = arith.constant 0 : i32
    %c0_i32_0 = arith.constant 0 : i32
    %c0_i32_1 = arith.constant 0 : i32
    return %c0_i32, %c0_i32_0 : i32, i32
  }
  func.func @transform_2(%arg0: i32) -> (i32, i32, i32) {
    %c0_i32 = arith.constant 0 : i32
    %c0_i32_0 = arith.constant 0 : i32
    %c0_i32_1 = arith.constant 0 : i32
    return %arg0, %c0_i32, %c0_i32_0 : i32, i32, i32
  }
}

module attributes {stable_mosaic.version = 11 : i64} {
  func.func @_conv_fused_kernel(%arg0: i32, %arg1: memref<1x288x16xbf16, #tpu.memory_space<vmem>>, %arg2: memref<32x288xbf16, #tpu.memory_space<vmem>>, %arg3: memref<1x32x16xf32, #tpu.memory_space<vmem>>, %arg4: memref<1x32x16xf32, #tpu.memory_space<vmem>>) attributes {dimension_semantics = [#tpu.dimension_semantics<parallel>], iteration_bounds = array<i64: 2>, scalar_prefetch = 0 : i64, scratch_operands = 0 : i64, tpu.core_type = #tpu.core_type<tc>, window_params = [{transform_indices = @transform_0, window_bounds = array<i64: 1, 288, 16>}, {pipeline_mode = #tpu.pipeline_mode<synchronous>, transform_indices = @transform_1, window_bounds = array<i64: 32, 288>}, {transform_indices = @transform_2, window_bounds = array<i64: 1, 32, 16>}, {transform_indices = @transform_3, window_bounds = array<i64: 1, 32, 16>}]} {
    %c0 = arith.constant 0 : index
    %c0_0 = arith.constant 0 : index
    %0 = vector.load %arg2[%c0, %c0_0] : memref<32x288xbf16, #tpu.memory_space<vmem>>, vector<32x288xbf16>
    %c0_1 = arith.constant 0 : index
    %c0_2 = arith.constant 0 : index
    %c0_3 = arith.constant 0 : index
    %1 = vector.load %arg1[%c0_1, %c0_2, %c0_3] : memref<1x288x16xbf16, #tpu.memory_space<vmem>>, vector<1x288x16xbf16>
    %2 = vector.shape_cast %1 : vector<1x288x16xbf16> to vector<288x16xbf16>
    %cst = arith.constant dense<0.000000e+00> : vector<32x16xf32>
    %3 = tpu.matmul %0, %2, %cst {dimension_numbers = #tpu.dot_dimension_numbers<[1], [0], [0], [1], [0, 0, 1, 1], [], []>} : vector<32x288xbf16>, vector<288x16xbf16>, vector<32x16xf32> -> vector<32x16xf32>
    %cst_4 = arith.constant dense<0.000000e+00> : vector<32xf32>
    %4 = vector.multi_reduction <add>, %3, %cst_4 [1] : vector<32x16xf32> to vector<32xf32>
    %5 = vector.shape_cast %4 : vector<32xf32> to vector<32x1xf32>
    %cst_5 = arith.constant 1.600000e+01 : f32
    %6 = vector.broadcast %cst_5 : f32 to vector<32x1xf32>
    %7 = arith.divf %5, %6 : vector<32x1xf32>
    %8 = arith.mulf %3, %3 : vector<32x16xf32>
    %cst_6 = arith.constant dense<0.000000e+00> : vector<32xf32>
    %9 = vector.multi_reduction <add>, %8, %cst_6 [1] : vector<32x16xf32> to vector<32xf32>
    %10 = vector.shape_cast %9 : vector<32xf32> to vector<32x1xf32>
    %cst_7 = arith.constant 1.600000e+01 : f32
    %11 = vector.broadcast %cst_7 : f32 to vector<32x1xf32>
    %12 = arith.divf %10, %11 : vector<32x1xf32>
    %13 = arith.mulf %7, %7 : vector<32x1xf32>
    %14 = arith.subf %12, %13 : vector<32x1xf32>
    %15 = vector.broadcast %7 : vector<32x1xf32> to vector<32x16xf32>
    %16 = arith.subf %3, %15 : vector<32x16xf32>
    %cst_8 = arith.constant 9.99999974E-6 : f32
    %17 = vector.broadcast %cst_8 : f32 to vector<32x1xf32>
    %18 = arith.addf %14, %17 : vector<32x1xf32>
    %19 = math.rsqrt %18 : vector<32x1xf32>
    %20 = vector.broadcast %19 : vector<32x1xf32> to vector<32x16xf32>
    %21 = arith.mulf %16, %20 : vector<32x16xf32>
    %c0_9 = arith.constant 0 : index
    %c0_10 = arith.constant 0 : index
    %c0_11 = arith.constant 0 : index
    %22 = vector.load %arg3[%c0_9, %c0_10, %c0_11] : memref<1x32x16xf32, #tpu.memory_space<vmem>>, vector<1x32x16xf32>
    %23 = vector.shape_cast %22 : vector<1x32x16xf32> to vector<32x16xf32>
    %24 = arith.addf %21, %23 : vector<32x16xf32>
    %c0_12 = arith.constant 0 : index
    %c0_13 = arith.constant 0 : index
    %c0_14 = arith.constant 0 : index
    %25 = vector.load %arg4[%c0_12, %c0_13, %c0_14] : memref<1x32x16xf32, #tpu.memory_space<vmem>>, vector<1x32x16xf32>
    %26 = vector.shape_cast %25 : vector<1x32x16xf32> to vector<32x16xf32>
    %27 = vector.shape_cast %24 : vector<32x16xf32> to vector<1x32x16xf32>
    tpu.vector_store %arg4[%c0_12, %c0_13, %c0_14], %27 {strides = array<i32>} : memref<1x32x16xf32, #tpu.memory_space<vmem>>, vector<1x32x16xf32>,
    return
  }
  func.func @transform_0(%arg0: i32) -> (i32, i32, i32) {
    %c0_i32 = arith.constant 0 : i32
    %c0_i32_0 = arith.constant 0 : i32
    %c0_i32_1 = arith.constant 0 : i32
    return %arg0, %c0_i32, %c0_i32_0 : i32, i32, i32
  }
  func.func @transform_1(%arg0: i32) -> (i32, i32) {
    %c0_i32 = arith.constant 0 : i32
    %c0_i32_0 = arith.constant 0 : i32
    %c0_i32_1 = arith.constant 0 : i32
    return %c0_i32, %c0_i32_0 : i32, i32
  }
  func.func @transform_2(%arg0: i32) -> (i32, i32, i32) {
    %c0_i32 = arith.constant 0 : i32
    %c0_i32_0 = arith.constant 0 : i32
    %c0_i32_1 = arith.constant 0 : i32
    return %arg0, %c0_i32, %c0_i32_0 : i32, i32, i32
  }
  func.func @transform_3(%arg0: i32) -> (i32, i32, i32) {
    %c0_i32 = arith.constant 0 : i32
    %c0_i32_0 = arith.constant 0 : i32
    %c0_i32_1 = arith.constant 0 : i32
    return %arg0, %c0_i32, %c0_i32_0 : i32, i32, i32
  }
}

module attributes {stable_mosaic.version = 11 : i64} {
  func.func @_conv_fused_kernel(%arg0: i32, %arg1: memref<1x288x64xbf16, #tpu.memory_space<vmem>>, %arg2: memref<16x288xbf16, #tpu.memory_space<vmem>>, %arg3: memref<1x16x64xf32, #tpu.memory_space<vmem>>) attributes {dimension_semantics = [#tpu.dimension_semantics<parallel>], iteration_bounds = array<i64: 2>, scalar_prefetch = 0 : i64, scratch_operands = 0 : i64, tpu.core_type = #tpu.core_type<tc>, window_params = [{transform_indices = @transform_0, window_bounds = array<i64: 1, 288, 64>}, {pipeline_mode = #tpu.pipeline_mode<synchronous>, transform_indices = @transform_1, window_bounds = array<i64: 16, 288>}, {transform_indices = @transform_2, window_bounds = array<i64: 1, 16, 64>}]} {
    %c0 = arith.constant 0 : index
    %c0_0 = arith.constant 0 : index
    %0 = vector.load %arg2[%c0, %c0_0] : memref<16x288xbf16, #tpu.memory_space<vmem>>, vector<16x288xbf16>
    %c0_1 = arith.constant 0 : index
    %c0_2 = arith.constant 0 : index
    %c0_3 = arith.constant 0 : index
    %1 = vector.load %arg1[%c0_1, %c0_2, %c0_3] : memref<1x288x64xbf16, #tpu.memory_space<vmem>>, vector<1x288x64xbf16>
    %2 = vector.shape_cast %1 : vector<1x288x64xbf16> to vector<288x64xbf16>
    %cst = arith.constant dense<0.000000e+00> : vector<16x64xf32>
    %3 = tpu.matmul %0, %2, %cst {dimension_numbers = #tpu.dot_dimension_numbers<[1], [0], [0], [1], [0, 0, 1, 1], [], []>} : vector<16x288xbf16>, vector<288x64xbf16>, vector<16x64xf32> -> vector<16x64xf32>
    %cst_4 = arith.constant dense<0.000000e+00> : vector<16xf32>
    %4 = vector.multi_reduction <add>, %3, %cst_4 [1] : vector<16x64xf32> to vector<16xf32>
    %5 = vector.shape_cast %4 : vector<16xf32> to vector<16x1xf32>
    %cst_5 = arith.constant 6.400000e+01 : f32
    %6 = vector.broadcast %cst_5 : f32 to vector<16x1xf32>
    %7 = arith.divf %5, %6 : vector<16x1xf32>
    %8 = arith.mulf %3, %3 : vector<16x64xf32>
    %cst_6 = arith.constant dense<0.000000e+00> : vector<16xf32>
    %9 = vector.multi_reduction <add>, %8, %cst_6 [1] : vector<16x64xf32> to vector<16xf32>
    %10 = vector.shape_cast %9 : vector<16xf32> to vector<16x1xf32>
    %cst_7 = arith.constant 6.400000e+01 : f32
    %11 = vector.broadcast %cst_7 : f32 to vector<16x1xf32>
    %12 = arith.divf %10, %11 : vector<16x1xf32>
    %13 = arith.mulf %7, %7 : vector<16x1xf32>
    %14 = arith.subf %12, %13 : vector<16x1xf32>
    %15 = vector.broadcast %7 : vector<16x1xf32> to vector<16x64xf32>
    %16 = arith.subf %3, %15 : vector<16x64xf32>
    %cst_8 = arith.constant 9.99999974E-6 : f32
    %17 = vector.broadcast %cst_8 : f32 to vector<16x1xf32>
    %18 = arith.addf %14, %17 : vector<16x1xf32>
    %19 = math.rsqrt %18 : vector<16x1xf32>
    %20 = vector.broadcast %19 : vector<16x1xf32> to vector<16x64xf32>
    %21 = arith.mulf %16, %20 : vector<16x64xf32>
    %cst_9 = arith.constant 0.000000e+00 : f32
    %22 = vector.broadcast %cst_9 : f32 to vector<16x64xf32>
    %23 = arith.maximumf %21, %22 : vector<16x64xf32>
    %c0_10 = arith.constant 0 : index
    %c0_11 = arith.constant 0 : index
    %c0_12 = arith.constant 0 : index
    %24 = vector.load %arg3[%c0_10, %c0_11, %c0_12] : memref<1x16x64xf32, #tpu.memory_space<vmem>>, vector<1x16x64xf32>
    %25 = vector.shape_cast %24 : vector<1x16x64xf32> to vector<16x64xf32>
    %26 = vector.shape_cast %23 : vector<16x64xf32> to vector<1x16x64xf32>
    tpu.vector_store %arg3[%c0_10, %c0_11, %c0_12], %26 {strides = array<i32>} : memref<1x16x64xf32, #tpu.memory_space<vmem>>, vector<1x16x64xf32>,
    return
  }
  func.func @transform_0(%arg0: i32) -> (i32, i32, i32) {
    %c0_i32 = arith.constant 0 : i32
    %c0_i32_0 = arith.constant 0 : i32
    %c0_i32_1 = arith.constant 0 : i32
    return %arg0, %c0_i32, %c0_i32_0 : i32, i32, i32
  }
  func.func @transform_1(%arg0: i32) -> (i32, i32) {
    %c0_i32 = arith.constant 0 : i32
    %c0_i32_0 = arith.constant 0 : i32
    %c0_i32_1 = arith.constant 0 : i32
    return %c0_i32, %c0_i32_0 : i32, i32
  }
  func.func @transform_2(%arg0: i32) -> (i32, i32, i32) {
    %c0_i32 = arith.constant 0 : i32
    %c0_i32_0 = arith.constant 0 : i32
    %c0_i32_1 = arith.constant 0 : i32
    return %arg0, %c0_i32, %c0_i32_0 : i32, i32, i32
  }
}

module attributes {stable_mosaic.version = 11 : i64} {
  func.func @_conv_fused_kernel(%arg0: i32, %arg1: memref<1x144x256xbf16, #tpu.memory_space<vmem>>, %arg2: memref<8x144xbf16, #tpu.memory_space<vmem>>, %arg3: memref<1x8x256xf32, #tpu.memory_space<vmem>>) attributes {dimension_semantics = [#tpu.dimension_semantics<parallel>], iteration_bounds = array<i64: 2>, scalar_prefetch = 0 : i64, scratch_operands = 0 : i64, tpu.core_type = #tpu.core_type<tc>, window_params = [{transform_indices = @transform_0, window_bounds = array<i64: 1, 144, 256>}, {pipeline_mode = #tpu.pipeline_mode<synchronous>, transform_indices = @transform_1, window_bounds = array<i64: 8, 144>}, {transform_indices = @transform_2, window_bounds = array<i64: 1, 8, 256>}]} {
    %c0 = arith.constant 0 : index
    %c0_0 = arith.constant 0 : index
    %0 = vector.load %arg2[%c0, %c0_0] : memref<8x144xbf16, #tpu.memory_space<vmem>>, vector<8x144xbf16>
    %c0_1 = arith.constant 0 : index
    %c0_2 = arith.constant 0 : index
    %c0_3 = arith.constant 0 : index
    %1 = vector.load %arg1[%c0_1, %c0_2, %c0_3] : memref<1x144x256xbf16, #tpu.memory_space<vmem>>, vector<1x144x256xbf16>
    %2 = vector.shape_cast %1 : vector<1x144x256xbf16> to vector<144x256xbf16>
    %cst = arith.constant dense<0.000000e+00> : vector<8x256xf32>
    %3 = tpu.matmul %0, %2, %cst {dimension_numbers = #tpu.dot_dimension_numbers<[1], [0], [0], [1], [0, 0, 1, 1], [], []>} : vector<8x144xbf16>, vector<144x256xbf16>, vector<8x256xf32> -> vector<8x256xf32>
    %cst_4 = arith.constant dense<0.000000e+00> : vector<8xf32>
    %4 = vector.multi_reduction <add>, %3, %cst_4 [1] : vector<8x256xf32> to vector<8xf32>
    %5 = vector.shape_cast %4 : vector<8xf32> to vector<8x1xf32>
    %cst_5 = arith.constant 2.560000e+02 : f32
    %6 = vector.broadcast %cst_5 : f32 to vector<8x1xf32>
    %7 = arith.divf %5, %6 : vector<8x1xf32>
    %8 = arith.mulf %3, %3 : vector<8x256xf32>
    %cst_6 = arith.constant dense<0.000000e+00> : vector<8xf32>
    %9 = vector.multi_reduction <add>, %8, %cst_6 [1] : vector<8x256xf32> to vector<8xf32>
    %10 = vector.shape_cast %9 : vector<8xf32> to vector<8x1xf32>
    %cst_7 = arith.constant 2.560000e+02 : f32
    %11 = vector.broadcast %cst_7 : f32 to vector<8x1xf32>
    %12 = arith.divf %10, %11 : vector<8x1xf32>
    %13 = arith.mulf %7, %7 : vector<8x1xf32>
    %14 = arith.subf %12, %13 : vector<8x1xf32>
    %15 = vector.broadcast %7 : vector<8x1xf32> to vector<8x256xf32>
    %16 = arith.subf %3, %15 : vector<8x256xf32>
    %cst_8 = arith.constant 9.99999974E-6 : f32
    %17 = vector.broadcast %cst_8 : f32 to vector<8x1xf32>
    %18 = arith.addf %14, %17 : vector<8x1xf32>
    %19 = math.rsqrt %18 : vector<8x1xf32>
    %20 = vector.broadcast %19 : vector<8x1xf32> to vector<8x256xf32>
    %21 = arith.mulf %16, %20 : vector<8x256xf32>
    %cst_9 = arith.constant 0.000000e+00 : f32
    %22 = vector.broadcast %cst_9 : f32 to vector<8x256xf32>
    %23 = arith.maximumf %21, %22 : vector<8x256xf32>
    %c0_10 = arith.constant 0 : index
    %c0_11 = arith.constant 0 : index
    %c0_12 = arith.constant 0 : index
    %24 = vector.load %arg3[%c0_10, %c0_11, %c0_12] : memref<1x8x256xf32, #tpu.memory_space<vmem>>, vector<1x8x256xf32>
    %25 = vector.shape_cast %24 : vector<1x8x256xf32> to vector<8x256xf32>
    %26 = vector.shape_cast %23 : vector<8x256xf32> to vector<1x8x256xf32>
    tpu.vector_store %arg3[%c0_10, %c0_11, %c0_12], %26 {strides = array<i32>} : memref<1x8x256xf32, #tpu.memory_space<vmem>>, vector<1x8x256xf32>,
    return
  }
  func.func @transform_0(%arg0: i32) -> (i32, i32, i32) {
    %c0_i32 = arith.constant 0 : i32
    %c0_i32_0 = arith.constant 0 : i32
    %c0_i32_1 = arith.constant 0 : i32
    return %arg0, %c0_i32, %c0_i32_0 : i32, i32, i32
  }
  func.func @transform_1(%arg0: i32) -> (i32, i32) {
    %c0_i32 = arith.constant 0 : i32
    %c0_i32_0 = arith.constant 0 : i32
    %c0_i32_1 = arith.constant 0 : i32
    return %c0_i32, %c0_i32_0 : i32, i32
  }
  func.func @transform_2(%arg0: i32) -> (i32, i32, i32) {
    %c0_i32 = arith.constant 0 : i32
    %c0_i32_0 = arith.constant 0 : i32
    %c0_i32_1 = arith.constant 0 : i32
    return %arg0, %c0_i32, %c0_i32_0 : i32, i32, i32
  }
}

module attributes {stable_mosaic.version = 11 : i64} {
  func.func @_conv_fused_kernel(%arg0: i32, %arg1: memref<1x648x256xbf16, #tpu.memory_space<vmem>>, %arg2: memref<3x648xbf16, #tpu.memory_space<vmem>>, %arg3: memref<3x1xf32, #tpu.memory_space<vmem>>, %arg4: memref<1x3x256xf32, #tpu.memory_space<vmem>>) attributes {dimension_semantics = [#tpu.dimension_semantics<parallel>], iteration_bounds = array<i64: 2>, scalar_prefetch = 0 : i64, scratch_operands = 0 : i64, tpu.core_type = #tpu.core_type<tc>, window_params = [{transform_indices = @transform_0, window_bounds = array<i64: 1, 648, 256>}, {pipeline_mode = #tpu.pipeline_mode<synchronous>, transform_indices = @transform_1, window_bounds = array<i64: 3, 648>}, {pipeline_mode = #tpu.pipeline_mode<synchronous>, transform_indices = @transform_2, window_bounds = array<i64: 3, 1>}, {transform_indices = @transform_3, window_bounds = array<i64: 1, 3, 256>}]} {
    %c0 = arith.constant 0 : index
    %c0_0 = arith.constant 0 : index
    %0 = vector.load %arg2[%c0, %c0_0] : memref<3x648xbf16, #tpu.memory_space<vmem>>, vector<3x648xbf16>
    %c0_1 = arith.constant 0 : index
    %c0_2 = arith.constant 0 : index
    %c0_3 = arith.constant 0 : index
    %1 = vector.load %arg1[%c0_1, %c0_2, %c0_3] : memref<1x648x256xbf16, #tpu.memory_space<vmem>>, vector<1x648x256xbf16>
    %2 = vector.shape_cast %1 : vector<1x648x256xbf16> to vector<648x256xbf16>
    %cst = arith.constant dense<0.000000e+00> : vector<3x256xf32>
    %3 = tpu.matmul %0, %2, %cst {dimension_numbers = #tpu.dot_dimension_numbers<[1], [0], [0], [1], [0, 0, 1, 1], [], []>} : vector<3x648xbf16>, vector<648x256xbf16>, vector<3x256xf32> -> vector<3x256xf32>
    %c0_4 = arith.constant 0 : index
    %c0_5 = arith.constant 0 : index
    %4 = vector.load %arg3[%c0_4, %c0_5] : memref<3x1xf32, #tpu.memory_space<vmem>>, vector<3x1xf32>
    %5 = vector.broadcast %4 : vector<3x1xf32> to vector<3x256xf32>
    %6 = arith.addf %3, %5 : vector<3x256xf32>
    %c0_6 = arith.constant 0 : index
    %c0_7 = arith.constant 0 : index
    %c0_8 = arith.constant 0 : index
    %7 = vector.load %arg4[%c0_6, %c0_7, %c0_8] : memref<1x3x256xf32, #tpu.memory_space<vmem>>, vector<1x3x256xf32>
    %8 = vector.shape_cast %7 : vector<1x3x256xf32> to vector<3x256xf32>
    %9 = vector.shape_cast %6 : vector<3x256xf32> to vector<1x3x256xf32>
    tpu.vector_store %arg4[%c0_6, %c0_7, %c0_8], %9 {strides = array<i32>} : memref<1x3x256xf32, #tpu.memory_space<vmem>>, vector<1x3x256xf32>,
    return
  }
  func.func @transform_0(%arg0: i32) -> (i32, i32, i32) {
    %c0_i32 = arith.constant 0 : i32
    %c0_i32_0 = arith.constant 0 : i32
    %c0_i32_1 = arith.constant 0 : i32
    return %arg0, %c0_i32, %c0_i32_0 : i32, i32, i32
  }
  func.func @transform_1(%arg0: i32) -> (i32, i32) {
    %c0_i32 = arith.constant 0 : i32
    %c0_i32_0 = arith.constant 0 : i32
    %c0_i32_1 = arith.constant 0 : i32
    return %c0_i32, %c0_i32_0 : i32, i32
  }
  func.func @transform_2(%arg0: i32) -> (i32, i32) {
    %c0_i32 = arith.constant 0 : i32
    %c0_i32_0 = arith.constant 0 : i32
    %c0_i32_1 = arith.constant 0 : i32
    return %c0_i32, %c0_i32_0 : i32, i32
  }
  func.func @transform_3(%arg0: i32) -> (i32, i32, i32) {
    %c0_i32 = arith.constant 0 : i32
    %c0_i32_0 = arith.constant 0 : i32
    %c0_i32_1 = arith.constant 0 : i32
    return %arg0, %c0_i32, %c0_i32_0 : i32, i32, i32
  }
}

</mosaic_0001>

<bundles_post_ra>
// kernel: transform_net_forward.16
= control target key start
LH: loop header
LB: loop body
LE: loop exit
PB: predicated region body
PF: predicated region fallthrough
CT: control target
= control target key end

     0   :  { %s601_s9 = smov 0   ;;  %s664_s0 = inlined_call_operand.vmem [shape: bf16[2,243,256], index: 0, kind: input, shape index: {}]   ;;  %s665_s1 = inlined_call_operand.vmem [shape: bf16[8,243], index: 1, kind: input, shape index: {}]   ;;  %s666_s2 = inlined_call_operand.vmem [shape: f32[2,8,256], index: 2, kind: output, shape index: {}]  }
   0x1 LB: > { %s470_s10 = sadd.s32 4294967295, %s583_s9   ;;  %p474_p0 = scmp.ge.s32.totalorder %s583_s9, 1  ;;  %s583_s9 = sphi %s601_s9, %s12_s9  }
   0x2   : > { %p112_p1 = scmp.lt.s32.totalorder %s583_s9, 3 }
   0x4   : > { %p113_p2 = pnand %p474_p0, %p112_p1 }
   0x5   : > { %p134_p3 = scmp.lt.s32.totalorder (!%p113_p2), %s470_s10, 1 }
   0x6   : > { %116 = sbr.rel (%p113_p2) target bundleno = 444 (0x1bc), region = 28 }
   0xb   : > { %v612_v0 = vld [vmem:[%s665_s1] sm:$0xff]  ;;  %vm337_vm0 = vcmask 941056   ;;  %s668_s10 = smov (!%p134_p3, %s470_s10), 1  ;;  %vm341_vm1 = vcmask 1040384   ;;  %vm342_vm2 = vcmask 1041408   ;;  %v585_v16 = vmov 65535  }
   0xc   : > { %v479_v1 = vcombine.high %v612_v0, %v612_v0  ;;  %s516_s13 = smul.u32 248, %s668_s10  ;;  %v343_v17 = vsel %vm341_vm1, 4294967295, %v585_v16  ;;  %v478_v40 = vcombine.low %v612_v0, %v612_v0  ;;  %s515_s17 = sshll.u32 %s668_s10, 4 }
   0xd   : > { %v344_v21 = vsel %vm342_vm2, %v343_v17, 0  ;;  %s143_s20 = scalar_lea.vmem %s666_s2, %s515_s17 }
   0xe   : > { %512 = vmatprep.mubr.msk.bf16.mxu0 %vm337_vm0, %v479_v1  ;;  %s622_s16 = scalar_lea.vmem %s664_s0, %s516_s13 }
   0xf   : > { %v526_v2 = vld [vmem:[%s622_s16 + $0x74] ss:$8 sps:$4 sm:$0xff]   ;;  %v528_v3 = vld [vmem:[%s622_s16 + $0x70] ss:$8 sps:$4 sm:$0xff]   ;;  %v529_v4 = vld [vmem:[%s622_s16 + $0x64] ss:$8 sps:$4 sm:$0xff]  }
  0x10   : > { %351 = vmatprep.subr.bf16.mxu0 %v526_v2  ;;  %v531_v5 = vld [vmem:[%s622_s16 + $0x60] ss:$8 sps:$4 sm:$0xff]   ;;  %v532_v6 = vld [vmem:[%s622_s16 + $0x54] ss:$8 sps:$4 sm:$0xff]   ;;  %v534_v7 = vld [vmem:[%s622_s16 + $0x50] ss:$8 sps:$4 sm:$0xff]  }
  0x11   : > { %352 = vmatpush1.bf16.msra.mxu0 %v528_v3  ;;  %v535_v8 = vld [vmem:[%s622_s16 + $0x44] ss:$8 sps:$4 sm:$0xff]   ;;  %v537_v9 = vld [vmem:[%s622_s16 + $0x40] ss:$8 sps:$4 sm:$0xff]   ;;  %v538_v10 = vld [vmem:[%s622_s16 + $0x34] ss:$8 sps:$4 sm:$0xff]  }
  0x12   : > { %353 = vmatprep.subr.bf16.mxu0 %v529_v4  ;;  %v540_v11 = vld [vmem:[%s622_s16 + $0x30] ss:$8 sps:$4 sm:$0xff]   ;;  %v541_v12 = vld [vmem:[%s622_s16 + $0x24] ss:$8 sps:$4 sm:$0xff]   ;;  %v543_v13 = vld [vmem:[%s622_s16 + $0x20] ss:$8 sps:$4 sm:$0xff]  }
  0x13   : > { %v544_v14 = vld [vmem:[%s622_s16 + $0x14] ss:$8 sps:$4 sm:$0xff]   ;;  %v546_v18 = vld [vmem:[%s622_s16 + $0x10] ss:$8 sps:$4 sm:$0xff]   ;;  %v547_v19 = vld [vmem:[%s622_s16 + $0x4] ss:$8 sps:$4 sm:$0xff]  }
  0x14   : > { %v175_v15 = vld [vmem:[%s622_s16 + $0xf0] sm:$0x33]  ;;  %v549_v22 = vld [vmem:[%s622_s16] ss:$8 sps:$4 sm:$0xff]   ;;  %v552_v26 = vld [vmem:[%s622_s16 + $0xe4] ss:$8 sps:$4 sm:$0xff]  }
  0x15   : > { %354 = vmatpush1.bf16.msra.mxu0 %v531_v5  ;;  %v511_v20 = vcombine.high %v175_v15, %v175_v15  ;;  %v510_v23 = vcombine.low %v175_v15, %v175_v15  ;;  %v554_v27 = vld [vmem:[%s622_s16 + $0xe0] ss:$8 sps:$4 sm:$0xff]   ;;  %v555_v28 = vld [vmem:[%s622_s16 + $0xd4] ss:$8 sps:$4 sm:$0xff]   ;;  %v557_v29 = vld [vmem:[%s622_s16 + $0xd0] ss:$8 sps:$4 sm:$0xff]  }
  0x16   : > { %355 = vmatprep.subr.bf16.mxu0 %v532_v6  ;;  %v558_v30 = vld [vmem:[%s622_s16 + $0xc4] ss:$8 sps:$4 sm:$0xff]   ;;  %v560_v31 = vld [vmem:[%s622_s16 + $0xc0] ss:$8 sps:$4 sm:$0xff]   ;;  %v561_v32 = vld [vmem:[%s622_s16 + $0xb4] ss:$8 sps:$4 sm:$0xff]  }
  0x17   : > { %v349_v24 = vand.u32 %v511_v20, %v344_v21  ;;  %v346_v25 = vand.u32 %v510_v23, %v344_v21  ;;  %v563_v33 = vld [vmem:[%s622_s16 + $0xb0] ss:$8 sps:$4 sm:$0xff]   ;;  %v564_v34 = vld [vmem:[%s622_s16 + $0xa4] ss:$8 sps:$4 sm:$0xff]   ;;  %v566_v35 = vld [vmem:[%s622_s16 + $0xa0] ss:$8 sps:$4 sm:$0xff]  }
  0x18   : > { %v567_v36 = vld [vmem:[%s622_s16 + $0x94] ss:$8 sps:$4 sm:$0xff]   ;;  %v569_v37 = vld [vmem:[%s622_s16 + $0x90] ss:$8 sps:$4 sm:$0xff]   ;;  %v570_v38 = vld [vmem:[%s622_s16 + $0x84] ss:$8 sps:$4 sm:$0xff]  }
  0x19   : > { %356 = vmatpush1.bf16.msra.mxu0 %v534_v7  ;;  %v572_v39 = vld [vmem:[%s622_s16 + $0x80] ss:$8 sps:$4 sm:$0xff]  }
  0x1a   : > { %357 = vmatprep.subr.bf16.mxu0 %v535_v8 }
  0x1d   : > { %358 = vmatpush1.bf16.msra.mxu0 %v537_v9 }
  0x1e   : > { %359 = vmatprep.subr.bf16.mxu0 %v538_v10 }
  0x21   : > { %360 = vmatpush1.bf16.msra.mxu0 %v540_v11 }
  0x22   : > { %361 = vmatprep.subr.bf16.mxu0 %v541_v12 }
  0x25   : > { %362 = vmatpush1.bf16.msra.mxu0 %v543_v13 }
  0x26   : > { %363 = vmatprep.subr.bf16.mxu0 %v544_v14 }
  0x29   : > { %364 = vmatpush1.bf16.msra.mxu0 %v546_v18 }
  0x2a   : > { %365 = vmatprep.subr.bf16.mxu0 %v547_v19 }
  0x2d   : > { %366 = vmatpush1.bf16.msra.mxu0 %v549_v22 }
  0x2e   : > { %367 = vmatprep.subr.bf16.mxu0 %v349_v24 }
  0x31   : > { %368 = vmatpush2.bf16.msra.mxu0 %v346_v25 }
  0x32   : > { %369 = vmatprep.subr.bf16.mxu0 %v552_v26 }
  0x35   : > { %370 = vmatpush2.bf16.msra.mxu0 %v554_v27 }
  0x36   : > { %371 = vmatprep.subr.bf16.mxu0 %v555_v28 }
  0x39   : > { %372 = vmatpush2.bf16.msra.mxu0 %v557_v29 }
  0x3a   : > { %373 = vmatprep.subr.bf16.mxu0 %v558_v30 }
  0x3d   : > { %374 = vmatpush2.bf16.msra.mxu0 %v560_v31 }
  0x3e   : > { %375 = vmatprep.subr.bf16.mxu0 %v561_v32 }
  0x41   : > { %376 = vmatpush2.bf16.msra.mxu0 %v563_v33 }
  0x42   : > { %377 = vmatprep.subr.bf16.mxu0 %v564_v34 }
  0x45   : > { %378 = vmatpush2.bf16.msra.mxu0 %v566_v35 }
  0x46   : > { %379 = vmatprep.subr.bf16.mxu0 %v567_v36 }
  0x49   : > { %380 = vmatpush2.bf16.msra.mxu0 %v569_v37 }
  0x4a   : > { %381 = vmatprep.subr.bf16.mxu0 %v570_v38 }
  0x4d   : > { %382 = vmatpush2.bf16.msra.mxu0 %v572_v39 }
  0x50   : > { %384 = vmatmul.mubr.bf16.vlgmr.msra.gmra.mxu0 %v478_v40 }
 0x110   : > { %v385_v41 = vpop.f32.mrf.mxu0 }
 0x111   : > { %v397_v46 = vmul.f32 %v385_v41, %v385_v41 }
 0x112   : > { %v387_v42 = vpop.f32.mrf.mxu0 }
 0x113   : > { %v392_v43 = vadd.f32 %v387_v42, %v385_v41  ;;  %v398_v44 = vmul.f32 %v387_v42, %v387_v42 }
 0x114   : > { %v389_v45 = vpop.f32.mrf.mxu0 }
 0x115   : > { %393 = vadd.xlane.f32.xlu0 %v392_v43  ;;  %v399_v48 = vadd.f32 %v398_v44, %v397_v46 }
 0x116   : > { %v390_v47 = vpop.f32.mrf.mxu0 }
 0x119   : > { %400 = vadd.xlane.f32.xlu0 %v399_v48 }
 0x19e   : > { %v394_v49 = vpop.xlane.xlu0 %393 }
 0x19f   : > { %v396_v50 = vmul.f32 0.00390625, %v394_v49 }
 0x1a1   : > { %v403_v52 = vmul.f32 %v396_v50, %v396_v50  ;;  %v405_v56 = vsub.f32 %v385_v41, %v396_v50  ;;  %v406_v57 = vsub.f32 %v387_v42, %v396_v50 }
 0x1a2   : > { %v401_v51 = vpop.xlane.xlu0 %400 }
 0x1a3   : > { %v402_v53 = vmul.f32 0.00390625, %v401_v51 }
 0x1a5   : > { %v404_v54 = vsub.f32 %v402_v53, %v403_v52 }
 0x1a7   : > { %v407_v55 = vadd.f32 1e-05, %v404_v54 }
 0x1a9   : > { %575 = vrsqrt.f32 %v407_v55 }
 0x1b6   : > { %v576_v58 = vpop.eup %575 }
 0x1b7   : > { %v409_v59 = vmul.f32 %v576_v58, %v405_v56  ;;  %v410_v60 = vmul.f32 %v576_v58, %v406_v57 }
 0x1b9   : > { %v411_v61 = vmax.f32 %v409_v59, 0.0  ;;  %v412_v62 = vmax.f32 %v410_v60, 0.0 }
 0x1bb   : > { %413 = vst [vmem:[%s143_s20] sm:$0xff] %v411_v61  ;;  %414 = vst [vmem:[%s143_s20 + $0x8] sm:$0xff] %v412_v62 }
 0x1bc PF: > { %s12_s9 = sadd.s32 1, %s583_s9  }
 0x1bd   : > { %p9_p4 = scmp.ge.s32.totalorder %s12_s9, 4  }
 0x1bf   :  { %11 = sbr.rel (!%p9_p4) target bundleno = 1 (0x1), region = 58 }

// kernel: transform_net_forward.17
= control target key start
LH: loop header
LB: loop body
LE: loop exit
PB: predicated region body
PF: predicated region fallthrough
CT: control target
= control target key end

     0   :  { %s437_s9 = smov 0   ;;  %s461_s0 = inlined_call_operand.vmem [shape: bf16[2,72,256], index: 0, kind: input, shape index: {}]   ;;  %s462_s1 = inlined_call_operand.vmem [shape: bf16[16,72], index: 1, kind: input, shape index: {}]   ;;  %s463_s2 = inlined_call_operand.vmem [shape: f32[2,16,256], index: 2, kind: output, shape index: {}]  }
   0x1 LB: > { %s360_s10 = sadd.s32 4294967295, %s419_s9   ;;  %p364_p0 = scmp.ge.s32.totalorder %s419_s9, 1  ;;  %s419_s9 = sphi %s437_s9, %s12_s9  }
   0x2   : > { %p112_p1 = scmp.lt.s32.totalorder %s419_s9, 3 }
   0x4   : > { %p113_p2 = pnand %p364_p0, %p112_p1 }
   0x5   : > { %p134_p3 = scmp.lt.s32.totalorder (!%p113_p2), %s360_s10, 1 }
   0x6   : > { %116 = sbr.rel (%p113_p2) target bundleno = 404 (0x194), region = 28 }
   0xb   : > { %v421_v0 = vmov 0   ;;  %s465_s10 = smov (!%p134_p3, %s360_s10), 1  ;;  %vm210_vm0 = vcmask 1043456   ;;  %v408_v13 = vld [vmem:[%s462_s1] sm:$0xff]   ;;  %vm206_vm1 = vcmask 588800  }
   0xc   : > { %249 = vmatprep.mubr.bf16.mxu0 %v421_v0  ;;  %s384_s11 = smul.u32 72, %s465_s10  ;;  %s383_s17 = sshll.u32 %s465_s10, 5 }
   0xd   : > { %s143_s20 = scalar_lea.vmem %s463_s2, %s383_s17 }
   0xe   : > { %s138_s14 = scalar_lea.vmem %s461_s0, %s384_s11 }
   0xf   : > { %v155_v1 = vld [vmem:[%s138_s14 + $0x40] sm:$0xff]  ;;  %v396_v4 = vld [vmem:[%s138_s14 + $0x34] ss:$8 sps:$4 sm:$0xff]   ;;  %v398_v6 = vld [vmem:[%s138_s14 + $0x30] ss:$8 sps:$4 sm:$0xff]  }
  0x10   : > { %v378_v2 = vcombine.high %v155_v1, %v155_v1  ;;  %v377_v3 = vcombine.low %v155_v1, %v155_v1  ;;  %v399_v7 = vld [vmem:[%s138_s14 + $0x24] ss:$8 sps:$4 sm:$0xff]   ;;  %v401_v8 = vld [vmem:[%s138_s14 + $0x20] ss:$8 sps:$4 sm:$0xff]   ;;  %v402_v9 = vld [vmem:[%s138_s14 + $0x14] ss:$8 sps:$4 sm:$0xff]  }
  0x11   : > { %v404_v10 = vld [vmem:[%s138_s14 + $0x10] ss:$8 sps:$4 sm:$0xff]   ;;  %v405_v11 = vld [vmem:[%s138_s14 + $0x4] ss:$8 sps:$4 sm:$0xff]   ;;  %v407_v12 = vld [vmem:[%s138_s14] ss:$8 sps:$4 sm:$0xff]  }
  0x12   : > { %379 = vmatprep.subr.msk.bf16.mxu0 %vm210_vm0, %v378_v2  ;;  %v212_v5 = vsel %vm210_vm0, %v377_v3, 0 }
  0x13   : > { %224 = vmatpush1.bf16.msra.mxu0 %v212_v5 }
  0x14   : > { %225 = vmatprep.subr.bf16.mxu0 %v396_v4 }
  0x17   : > { %226 = vmatpush1.bf16.msra.mxu0 %v398_v6 }
  0x18   : > { %227 = vmatprep.subr.bf16.mxu0 %v399_v7 }
  0x1b   : > { %228 = vmatpush1.bf16.msra.mxu0 %v401_v8 }
  0x1c   : > { %229 = vmatprep.subr.bf16.mxu0 %v402_v9 }
  0x1f   : > { %230 = vmatpush1.bf16.msra.mxu0 %v404_v10 }
  0x20   : > { %231 = vmatprep.subr.bf16.mxu0 %v405_v11 }
  0x23   : > { %232 = vmatpush1.bf16.msra.mxu0 %v407_v12 }
  0x26   : > { %380 = vmatmul.mubr.msk.bf16.vlgmr.msra.gmra.mxu0 %vm206_vm1, %v408_v13 }
  0xe6   : > { %v251_v14 = vpop.f32.mrf.mxu0 }
  0xe7   : > { %v269_v17 = vmul.f32 %v251_v14, %v251_v14 }
  0xe8   : > { %v253_v15 = vpop.f32.mrf.mxu0 }
  0xe9   : > { %v260_v16 = vadd.f32 %v253_v15, %v251_v14  ;;  %v270_v18 = vmul.f32 %v253_v15, %v253_v15 }
  0xea   : > { %v255_v19 = vpop.f32.mrf.mxu0 }
  0xeb   : > { %261 = vadd.xlane.f32.xlu0 %v260_v16  ;;  %v273_v20 = vadd.f32 %v270_v18, %v269_v17  ;;  %v271_v24 = vmul.f32 %v255_v19, %v255_v19 }
  0xec   : > { %v257_v21 = vpop.f32.mrf.mxu0 }
  0xed   : > { %v272_v22 = vmul.f32 %v257_v21, %v257_v21  ;;  %274 = vadd.xlane.f32.xlu1 %v273_v20  ;;  %v263_v23 = vadd.f32 %v257_v21, %v255_v19 }
  0xef   : > { %264 = vadd.xlane.f32.xlu0 %v263_v23  ;;  %v276_v25 = vadd.f32 %v272_v22, %v271_v24 }
  0xf1   : > { %277 = vadd.xlane.f32.xlu1 %v276_v25 }
 0x174   : > { %v262_v26 = vpop.xlane.xlu0 %261 }
 0x175   : > { %v267_v27 = vmul.f32 0.00390625, %v262_v26 }
 0x176   : > { %v275_v28 = vpop.xlane.xlu1 %274 }
 0x177   : > { %v279_v29 = vmul.f32 0.00390625, %v275_v28  ;;  %v281_v30 = vmul.f32 %v267_v27, %v267_v27  ;;  %v285_v40 = vsub.f32 %v251_v14, %v267_v27  ;;  %v286_v41 = vsub.f32 %v253_v15, %v267_v27 }
 0x178   : > { %v265_v31 = vpop.xlane.xlu0 %264 }
 0x179   : > { %v283_v32 = vsub.f32 %v279_v29, %v281_v30  ;;  %v268_v33 = vmul.f32 0.00390625, %v265_v31 }
 0x17a   : > { %v278_v34 = vpop.xlane.xlu1 %277 }
 0x17b   : > { %v289_v35 = vadd.f32 1e-05, %v283_v32  ;;  %v280_v36 = vmul.f32 0.00390625, %v278_v34  ;;  %v282_v37 = vmul.f32 %v268_v33, %v268_v33  ;;  %v287_v47 = vsub.f32 %v255_v19, %v268_v33 }
 0x17c   : > { %v288_v48 = vsub.f32 %v257_v21, %v268_v33 }
 0x17d   : > { %409 = vrsqrt.f32 %v289_v35  ;;  %v284_v38 = vsub.f32 %v280_v36, %v282_v37 }
 0x17f   : > { %v290_v39 = vadd.f32 1e-05, %v284_v38 }
 0x181   : > { %411 = vrsqrt.f32 %v290_v39 }
 0x18a   : > { %v410_v42 = vpop.eup %409 }
 0x18b   : > { %v293_v43 = vmul.f32 %v410_v42, %v285_v40  ;;  %v294_v44 = vmul.f32 %v410_v42, %v286_v41 }
 0x18d   : > { %v297_v45 = vmax.f32 %v293_v43, 0.0  ;;  %v298_v46 = vmax.f32 %v294_v44, 0.0 }
 0x18e   : > { %v412_v49 = vpop.eup %411 }
 0x18f   : > { %301 = vst [vmem:[%s143_s20] sm:$0xff] %v297_v45  ;;  %302 = vst [vmem:[%s143_s20 + $0x8] sm:$0xff] %v298_v46  ;;  %v295_v50 = vmul.f32 %v412_v49, %v287_v47  ;;  %v296_v51 = vmul.f32 %v412_v49, %v288_v48 }
 0x191   : > { %v299_v52 = vmax.f32 %v295_v50, 0.0  ;;  %v300_v53 = vmax.f32 %v296_v51, 0.0 }
 0x193   : > { %303 = vst [vmem:[%s143_s20 + $0x10] sm:$0xff] %v299_v52  ;;  %304 = vst [vmem:[%s143_s20 + $0x18] sm:$0xff] %v300_v53 }
 0x194 PF: > { %s12_s9 = sadd.s32 1, %s419_s9  }
 0x195   : > { %p9_p4 = scmp.ge.s32.totalorder %s12_s9, 4  }
 0x197   :  { %11 = sbr.rel (!%p9_p4) target bundleno = 1 (0x1), region = 58 }

// kernel: transform_net_forward.18
= control target key start
LH: loop header
LB: loop body
LE: loop exit
PB: predicated region body
PF: predicated region fallthrough
CT: control target
= control target key end

     0   :  { %s521_s9 = smov 0   ;;  %s595_s0 = inlined_call_operand.vmem [shape: bf16[2,144,64], index: 0, kind: input, shape index: {}]   ;;  %s596_s1 = inlined_call_operand.vmem [shape: bf16[32,144], index: 1, kind: input, shape index: {}]   ;;  %s597_s2 = inlined_call_operand.vmem [shape: f32[2,32,64], index: 2, kind: output, shape index: {}]  }
   0x1 LB: > { %s420_s10 = sadd.s32 4294967295, %s503_s9   ;;  %p424_p0 = scmp.ge.s32.totalorder %s503_s9, 1  ;;  %s503_s9 = sphi %s521_s9, %s12_s9  }
   0x2   : > { %p112_p1 = scmp.lt.s32.totalorder %s503_s9, 3 }
   0x4   : > { %p113_p2 = pnand %p424_p0, %p112_p1 }
   0x5   : > { %p134_p3 = scmp.lt.s32.totalorder (!%p113_p2), %s420_s10, 1 }
   0x6   : > { %116 = sbr.rel (%p113_p2) target bundleno = 421 (0x1a5), region = 28 }
   0xb   : > { %v505_v0 = vmov 0   ;;  %v485_v1 = vld [vmem:[%s596_s1 + $0x4] ss:$8 sps:$4 sm:$0xff]   ;;  %vm239_vm0 = vcmask 130048   ;;  %s599_s10 = smov (!%p134_p3, %s420_s10), 1  ;;  %vm295_vm1 = vcmask 523264  }
   0xc   : > { %246 = vmatprep.subr.bf16.mxu0 %v505_v0  ;;  %446 = vmatprep.subr.bf16.mxu1 %v505_v0  ;;  %v488_v2 = vld [vmem:[%s596_s1 + $0x14] ss:$8 sps:$4 sm:$0xff]   ;;  %s464_s15 = smul.u32 72, %s599_s10  ;;  %v483_v12 = vld [vmem:[%s596_s1] ss:$8 sps:$4 sm:$0xff]   ;;  %s445_s23 = sshll.u32 %s599_s10, 5 }
   0xd   : > { %441 = vmatprep.mubr.msk.bf16.mxu0 %vm239_vm0, %v485_v1  ;;  %442 = vmatprep.mubr.msk.bf16.mxu1 %vm239_vm0, %v488_v2  ;;  %v486_v13 = vld [vmem:[%s596_s1 + $0x10] ss:$8 sps:$4 sm:$0xff]   ;;  %s143_s26 = scalar_lea.vmem %s597_s2, %s445_s23 }
   0xe   : > { %s541_s18 = scalar_lea.vmem %s595_s0, %s464_s15 }
   0xf   : > { %v474_v3 = vld [vmem:[%s541_s18 + $0x38] sm:$0xff]   ;;  %v475_v4 = vld [vmem:[%s541_s18 + $0x30] sm:$0xff]   ;;  %v476_v5 = vld [vmem:[%s541_s18 + $0x28] sm:$0xff]  }
  0x10   : > { %247 = vmatpush1.bf16.msra.mxu0 %v474_v3  ;;  %455 = vmatpush1.bf16.msra.mxu1 %v474_v3  ;;  %v477_v6 = vld [vmem:[%s541_s18 + $0x20] sm:$0xff]   ;;  %v478_v7 = vld [vmem:[%s541_s18 + $0x18] sm:$0xff]   ;;  %v479_v8 = vld [vmem:[%s541_s18 + $0x10] sm:$0xff]  }
  0x11   : > { %248 = vmatprep.subr.bf16.mxu0 %v505_v0  ;;  %447 = vmatprep.subr.bf16.mxu1 %v505_v0  ;;  %v480_v9 = vld [vmem:[%s541_s18 + $0x8] sm:$0xff]   ;;  %v481_v10 = vld [vmem:[%s541_s18] sm:$0xff]  }
  0x12   : > { %v482_v11 = vld [vmem:[%s541_s18 + $0x40] sm:$0xff]  }
  0x14   : > { %249 = vmatpush1.bf16.msra.mxu0 %v475_v4  ;;  %456 = vmatpush1.bf16.msra.mxu1 %v475_v4 }
  0x15   : > { %250 = vmatprep.subr.bf16.mxu0 %v505_v0  ;;  %448 = vmatprep.subr.bf16.mxu1 %v505_v0 }
  0x18   : > { %251 = vmatpush1.bf16.msra.mxu0 %v476_v5  ;;  %457 = vmatpush1.bf16.msra.mxu1 %v476_v5 }
  0x19   : > { %252 = vmatprep.subr.bf16.mxu0 %v505_v0  ;;  %449 = vmatprep.subr.bf16.mxu1 %v505_v0 }
  0x1c   : > { %253 = vmatpush1.bf16.msra.mxu0 %v477_v6  ;;  %458 = vmatpush1.bf16.msra.mxu1 %v477_v6 }
  0x1d   : > { %254 = vmatprep.subr.bf16.mxu0 %v505_v0  ;;  %450 = vmatprep.subr.bf16.mxu1 %v505_v0 }
  0x20   : > { %255 = vmatpush1.bf16.msra.mxu0 %v478_v7  ;;  %459 = vmatpush1.bf16.msra.mxu1 %v478_v7 }
  0x21   : > { %256 = vmatprep.subr.bf16.mxu0 %v505_v0  ;;  %451 = vmatprep.subr.bf16.mxu1 %v505_v0 }
  0x24   : > { %257 = vmatpush1.bf16.msra.mxu0 %v479_v8  ;;  %460 = vmatpush1.bf16.msra.mxu1 %v479_v8 }
  0x25   : > { %258 = vmatprep.subr.bf16.mxu0 %v505_v0  ;;  %452 = vmatprep.subr.bf16.mxu1 %v505_v0 }
  0x28   : > { %259 = vmatpush1.bf16.msra.mxu0 %v480_v9  ;;  %461 = vmatpush1.bf16.msra.mxu1 %v480_v9 }
  0x29   : > { %260 = vmatprep.subr.bf16.mxu0 %v505_v0  ;;  %453 = vmatprep.subr.bf16.mxu1 %v505_v0 }
  0x2c   : > { %261 = vmatpush1.bf16.msra.mxu0 %v481_v10  ;;  %462 = vmatpush1.bf16.msra.mxu1 %v481_v10 }
  0x2d   : > { %276 = vmatprep.subr.bf16.mxu0 %v505_v0  ;;  %454 = vmatprep.subr.bf16.mxu1 %v505_v0 }
  0x30   : > { %277 = vmatpush2.bf16.msra.mxu0 %v482_v11  ;;  %463 = vmatpush2.bf16.msra.mxu1 %v482_v11 }
  0x33   : > { %279 = vmatmul.mubr.bf16.vlgmr.msra.gmra.mxu0 %v483_v12  ;;  %287 = vmatmul.mubr.bf16.vlgmr.msra.gmra.mxu1 %v486_v13 }
  0xf3   : > { %v558_v14 = vpop.f32.mrf.mxu0  ;;  %v560_v15 = vpop.f32.mrf.mxu1 }
  0xf4   : > { %v302_v16 = vsel %vm295_vm1, %v560_v15, 0.0  ;;  %v296_v17 = vsel %vm295_vm1, %v558_v14, 0.0  ;;  %v313_v18 = vmul.f32 %v558_v14, %v558_v14  ;;  %v315_v31 = vmul.f32 %v560_v15, %v560_v15 }
  0xf5   : > { %303 = vadd.xlane.f32.xlu1 %v302_v16  ;;  %v290_v19 = vpop.f32.mrf.mxu1  ;;  %297 = vadd.xlane.f32.xlu0 %v296_v17  ;;  %v282_v20 = vpop.f32.mrf.mxu0 }
  0xf6   : > { %v317_v24 = vsel %vm295_vm1, %v313_v18, 0.0  ;;  %v323_v33 = vsel %vm295_vm1, %v315_v31, 0.0 }
  0xf7   : > { %v283_v21 = vpop.f32.mrf.mxu0  ;;  %v568_v22 = vpop.f32.mrf.mxu1 }
  0xf8   : > { %v305_v23 = vsel %vm295_vm1, %v568_v22, 0.0  ;;  %v314_v25 = vmul.f32 %v283_v21, %v283_v21  ;;  %v299_v29 = vsel %vm295_vm1, %v283_v21, 0.0  ;;  %v316_v30 = vmul.f32 %v568_v22, %v568_v22 }
  0xf9   : > { %306 = vadd.xlane.f32.xlu1 %v305_v23  ;;  %v293_v26 = vpop.f32.mrf.mxu1  ;;  %318 = vadd.xlane.f32.xlu0 %v317_v24  ;;  %v285_v27 = vpop.f32.mrf.mxu0 }
  0xfa   : > { %v320_v28 = vsel %vm295_vm1, %v314_v25, 0.0  ;;  %v326_v32 = vsel %vm295_vm1, %v316_v30, 0.0 }
  0xfd   : > { %321 = vadd.xlane.f32.xlu1 %v320_v28  ;;  %300 = vadd.xlane.f32.xlu0 %v299_v29 }
 0x101   : > { %327 = vadd.xlane.f32.xlu1 %v326_v32  ;;  %324 = vadd.xlane.f32.xlu0 %v323_v33 }
 0x17e   : > { %v304_v34 = vpop.xlane.xlu1 %303  ;;  %v298_v35 = vpop.xlane.xlu0 %297 }
 0x17f   : > { %v309_v36 = vmul.f32 0.015625, %v298_v35  ;;  %v311_v42 = vmul.f32 0.015625, %v304_v34 }
 0x181   : > { %v333_v39 = vmul.f32 %v309_v36, %v309_v36  ;;  %v335_v50 = vmul.f32 %v311_v42, %v311_v42  ;;  %v341_v62 = vsub.f32 %v558_v14, %v309_v36  ;;  %v343_v7 = vsub.f32 %v560_v15, %v311_v42 }
 0x182   : > { %v307_v37 = vpop.xlane.xlu1 %306  ;;  %v319_v38 = vpop.xlane.xlu0 %318 }
 0x183   : > { %v329_v40 = vmul.f32 0.015625, %v319_v38  ;;  %v312_v45 = vmul.f32 0.015625, %v307_v37 }
 0x185   : > { %v337_v41 = vsub.f32 %v329_v40, %v333_v39  ;;  %v336_v53 = vmul.f32 %v312_v45, %v312_v45  ;;  %v344_v4 = vsub.f32 %v568_v22, %v312_v45 }
 0x186   : > { %v322_v43 = vpop.xlane.xlu1 %321  ;;  %v301_v44 = vpop.xlane.xlu0 %300 }
 0x187   : > { %v345_v46 = vadd.f32 1e-05, %v337_v41  ;;  %v310_v47 = vmul.f32 0.015625, %v301_v44  ;;  %v330_v48 = vmul.f32 0.015625, %v322_v43 }
 0x189   : > { %489 = vrsqrt.f32 %v345_v46  ;;  %v334_v49 = vmul.f32 %v310_v47, %v310_v47  ;;  %v342_v2 = vsub.f32 %v283_v21, %v310_v47 }
 0x18a   : > { %v328_v51 = vpop.xlane.xlu1 %327  ;;  %v325_v52 = vpop.xlane.xlu0 %324 }
 0x18b   : > { %v338_v54 = vsub.f32 %v330_v48, %v334_v49  ;;  %v332_v55 = vmul.f32 0.015625, %v328_v51  ;;  %v331_v56 = vmul.f32 0.015625, %v325_v52 }
 0x18d   : > { %v346_v57 = vadd.f32 1e-05, %v338_v54  ;;  %v340_v58 = vsub.f32 %v332_v55, %v336_v53  ;;  %v339_v59 = vsub.f32 %v331_v56, %v335_v50 }
 0x18f   : > { %491 = vrsqrt.f32 %v346_v57  ;;  %v348_v60 = vadd.f32 1e-05, %v340_v58  ;;  %v347_v61 = vadd.f32 1e-05, %v339_v59 }
 0x191   : > { %493 = vrsqrt.f32 %v348_v60 }
 0x192   : > { %495 = vrsqrt.f32 %v347_v61 }
 0x196   : > { %v490_v63 = vpop.eup %489 }
 0x197   : > { %v353_v0 = vmul.f32 %v490_v63, %v341_v62 }
 0x199   : > { %v357_v1 = vmax.f32 %v353_v0, 0.0 }
 0x19b   : > { %361 = vst.msk [vmem:[%s143_s26] sm:$0xff] %vm295_vm1, %v357_v1 }
 0x19c   : > { %v492_v3 = vpop.eup %491 }
 0x19d   : > { %v354_v5 = vmul.f32 %v492_v3, %v342_v2 }
 0x19e   : > { %v494_v6 = vpop.eup %493 }
 0x19f   : > { %v496_v8 = vpop.eup %495  ;;  %v358_v9 = vmax.f32 %v354_v5, 0.0  ;;  %v356_v10 = vmul.f32 %v494_v6, %v344_v4 }
 0x1a0   : > { %v355_v11 = vmul.f32 %v496_v8, %v343_v7 }
 0x1a1   : > { %362 = vst.msk [vmem:[%s143_s26 + $0x8] sm:$0xff] %vm295_vm1, %v358_v9  ;;  %v360_v12 = vmax.f32 %v356_v10, 0.0 }
 0x1a2   : > { %v359_v13 = vmax.f32 %v355_v11, 0.0 }
 0x1a3   : > { %364 = vst.msk [vmem:[%s143_s26 + $0x18] sm:$0xff] %vm295_vm1, %v360_v12 }
 0x1a4   : > { %363 = vst.msk [vmem:[%s143_s26 + $0x10] sm:$0xff] %vm295_vm1, %v359_v13 }
 0x1a5 PF: > { %s12_s9 = sadd.s32 1, %s503_s9  }
 0x1a6   : > { %p9_p4 = scmp.ge.s32.totalorder %s12_s9, 4  }
 0x1a8   :  { %11 = sbr.rel (!%p9_p4) target bundleno = 1 (0x1), region = 58 }

// kernel: transform_net_forward.20
= control target key start
LH: loop header
LB: loop body
LE: loop exit
PB: predicated region body
PF: predicated region fallthrough
CT: control target
= control target key end

     0   :  { %s771_s12 = smov 0   ;;  %s871_s0 = inlined_call_operand.vmem [shape: bf16[2,288,16], index: 0, kind: input, shape index: {}]   ;;  %s872_s1 = inlined_call_operand.vmem [shape: bf16[32,288], index: 1, kind: input, shape index: {}]   ;;  %s873_s2 = inlined_call_operand.vmem [shape: f32[2,32,16], index: 2, kind: input, shape index: {}]   ;;  %s874_s3 = inlined_call_operand.vmem [shape: f32[2,32,16], index: 3, kind: output, shape index: {}]  }
   0x1 LB: > { %s620_s13 = sadd.s32 4294967295, %s749_s12   ;;  %p624_p0 = scmp.ge.s32.totalorder %s749_s12, 1  ;;  %s749_s12 = sphi %s771_s12, %s13_s12  }
   0x2   : > { %p147_p1 = scmp.lt.s32.totalorder %s749_s12, 3 }
   0x4   : > { %p148_p2 = pnand %p624_p0, %p147_p1 }
   0x5   : > { %p176_p3 = scmp.lt.s32.totalorder (!%p148_p2), %s620_s13, 1 }
   0x6   : > { %151 = sbr.rel (%p148_p2) target bundleno = 429 (0x1ad), region = 32 }
   0xb   : > { %vm374_vm0 = vcmask 261120   ;;  %v725_v0 = vld [vmem:[%s872_s1 + $0x8] ss:$12 sps:$4 sm:$0xff]   ;;  %s876_s13 = smov (!%p176_p3, %s620_s13), 1  ;;  %v731_v1 = vld [vmem:[%s872_s1 + $0x4] ss:$12 sps:$4 sm:$0xff]  }
   0xc   : > { %696 = vmatprep.mubr.msk.bf16.mxu1 %vm374_vm0, %v725_v0  ;;  %s700_s18 = smul.u32 144, %s876_s13  ;;  %413 = vmatprep.mubr.bf16.mxu0 %v731_v1  ;;  %v727_v15 = vld [vmem:[%s872_s1 + $0x20] ss:$12 sps:$4 sm:$0xff]   ;;  %v732_v22 = vld [vmem:[%s872_s1 + $0x1c] ss:$12 sps:$4 sm:$0xff]   ;;  %vm479_vm1 = vcmask 130048  }
   0xd   : > { %v729_v21 = vld [vmem:[%s872_s1] ss:$12 sps:$4 sm:$0xff]   ;;  %v734_v23 = vld [vmem:[%s872_s1 + $0x18] ss:$12 sps:$4 sm:$0xff]   ;;  %s658_s30 = sshll.u32 %s876_s13, 5 }
   0xe   : > { %s792_s21 = scalar_lea.vmem %s871_s0, %s700_s18  ;;  %s185_s6 = scalar_lea.vmem %s873_s2, %s658_s30 }
   0xf   : > { %v709_v2 = vld [vmem:[%s792_s21 + $0x78] sm:$0xff]   ;;  %v711_v4 = vld [vmem:[%s792_s21 + $0x70] sm:$0xff]   ;;  %v713_v6 = vld [vmem:[%s792_s21 + $0x68] sm:$0xff]   ;;  %s190_s9 = scalar_lea.vmem %s874_s3, %s658_s30 }
  0x10   : > { %v710_v3 = vld [vmem:[%s792_s21 + $0x38] sm:$0xff]   ;;  %660 = vmatprep.subr.bf16.mxu0 %v709_v2  ;;  %v712_v5 = vld [vmem:[%s792_s21 + $0x30] sm:$0xff]   ;;  %v714_v7 = vld [vmem:[%s792_s21 + $0x28] sm:$0xff]  }
  0x11   : > { %661 = vmatpush3.bf16.msra.mxu0 %v710_v3  ;;  %v715_v8 = vld [vmem:[%s792_s21 + $0x60] sm:$0xff]   ;;  %v720_v10 = vld [vmem:[%s792_s21 + $0x88] sm:$0xff]   ;;  %v717_v11 = vld [vmem:[%s792_s21 + $0x58] sm:$0xff]  }
  0x12   : > { %662 = vmatprep.subr.bf16.mxu0 %v711_v4  ;;  %v716_v9 = vld [vmem:[%s792_s21 + $0x20] sm:$0xff]   ;;  %692 = vmatprep.subr.bf16.mxu1 %v720_v10  ;;  %v718_v13 = vld [vmem:[%s792_s21 + $0x18] sm:$0xff]   ;;  %v719_v14 = vld [vmem:[%s792_s21 + $0x50] sm:$0xff]  }
  0x13   : > { %693 = vmatpush3.bf16.msra.mxu1 %v720_v10  ;;  %v723_v12 = vld [vmem:[%s792_s21 + $0x80] sm:$0xff]   ;;  %v721_v16 = vld [vmem:[%s792_s21 + $0x10] sm:$0xff]   ;;  %v722_v17 = vld [vmem:[%s792_s21 + $0x48] sm:$0xff]  }
  0x14   : > { %694 = vmatprep.subr.bf16.mxu1 %v723_v12  ;;  %v724_v18 = vld [vmem:[%s792_s21 + $0x8] sm:$0xff]   ;;  %v726_v19 = vld [vmem:[%s792_s21 + $0x40] sm:$0xff]  }
  0x15   : > { %663 = vmatpush3.bf16.msra.mxu0 %v712_v5  ;;  %v728_v20 = vld [vmem:[%s792_s21] sm:$0xff]  }
  0x16   : > { %664 = vmatprep.subr.bf16.mxu0 %v713_v6 }
  0x17   : > { %695 = vmatpush3.bf16.msra.mxu1 %v723_v12 }
  0x19   : > { %665 = vmatpush3.bf16.msra.mxu0 %v714_v7 }
  0x1a   : > { %666 = vmatprep.subr.bf16.mxu0 %v715_v8  ;;  %697 = vmatmul.mubr.msk.bf16.vlgmr.msra.gmra.mxu1 %vm374_vm0, %v727_v15 }
  0x1d   : > { %667 = vmatpush3.bf16.msra.mxu0 %v716_v9 }
  0x1e   : > { %668 = vmatprep.subr.bf16.mxu0 %v717_v11 }
  0x21   : > { %669 = vmatpush3.bf16.msra.mxu0 %v718_v13 }
  0x22   : > { %670 = vmatprep.subr.bf16.mxu0 %v719_v14 }
  0x25   : > { %671 = vmatpush3.bf16.msra.mxu0 %v721_v16 }
  0x26   : > { %672 = vmatprep.subr.bf16.mxu0 %v722_v17 }
  0x29   : > { %673 = vmatpush3.bf16.msra.mxu0 %v724_v18 }
  0x2a   : > { %674 = vmatprep.subr.bf16.mxu0 %v726_v19 }
  0x2d   : > { %675 = vmatpush3.bf16.msra.mxu0 %v728_v20 }
  0x30   : > { %414 = vmatmul.mubr.bf16.vlgmr.msra.gmra.mxu0 %v729_v21 }
  0x31   : > { %421 = vmatprep.mubr.bf16.mxu0 %v732_v22  ;;  %v541_v22 = vld [vmem:[%s185_s6] sm:$0xff] }
  0x38   : > { %422 = vmatmul.mubr.bf16.gmra.mxu0 %v734_v23 }
  0xda   : > { %v698_v24 = vpop.f32.mrf.mxu1 }
  0xdc   : > { %v464_v25 = vpop.f32.mrf.mxu1 }
  0xde   : > { %v699_v29 = vpop.f32.mrf.mxu1 }
  0xe0   : > { %v467_v36 = vpop.f32.mrf.mxu1 }
  0xf0   : > { %v676_v26 = vpop.f32.mrf.mxu0 }
  0xf2   : > { %v677_v27 = vpop.f32.mrf.mxu0 }
  0xf3   : > { %v678_v28 = vadd.f32 %v677_v27, %v676_v26  ;;  %v542_v27 = vld [vmem:[%s185_s6 + $0x8] sm:$0xff] }
  0xf4   : > { %v679_v30 = vpop.f32.mrf.mxu0 }
  0xf5   : > { %v825_v31 = vadd.f32 %v678_v28, %v464_v25 }
  0xf6   : > { %v680_v32 = vpop.f32.mrf.mxu0 }
  0xf7   : > { %v681_v33 = vadd.f32 %v680_v32, %v679_v30  ;;  %v480_v34 = vsel %vm479_vm1, %v825_v31, 0.0  ;;  %v497_v35 = vmul.f32 %v825_v31, %v825_v31 }
  0xf8   : > { %v682_v37 = vpop.f32.mrf.mxu0  ;;  %481 = vadd.xlane.f32.xlu0 %v480_v34 }
  0xf9   : > { %v831_v38 = vadd.f32 %v681_v33, %v467_v36  ;;  %v501_v41 = vsel %vm479_vm1, %v497_v35, 0.0 }
  0xfa   : > { %v683_v39 = vpop.f32.mrf.mxu0 }
  0xfb   : > { %v684_v40 = vadd.f32 %v683_v39, %v682_v37  ;;  %v498_v42 = vmul.f32 %v831_v38, %v831_v38  ;;  %v483_v48 = vsel %vm479_vm1, %v831_v38, 0.0  ;;  %v544_v37 = vld [vmem:[%s185_s6 + $0x18] sm:$0xff] }
  0xfc   : > { %v685_v43 = vpop.f32.mrf.mxu0  ;;  %502 = vadd.xlane.f32.xlu0 %v501_v41 }
  0xfd   : > { %v836_v44 = vadd.f32 %v698_v24, %v684_v40  ;;  %v504_v45 = vsel %vm479_vm1, %v498_v42, 0.0 }
  0xfe   : > { %v686_v46 = vpop.f32.mrf.mxu0  ;;  %505 = vadd.xlane.f32.xlu1 %v504_v45 }
  0xff   : > { %v687_v47 = vadd.f32 %v686_v46, %v685_v43  ;;  %v499_v49 = vmul.f32 %v836_v44, %v836_v44  ;;  %v486_v51 = vsel %vm479_vm1, %v836_v44, 0.0 }
 0x100   : > { %484 = vadd.xlane.f32.xlu0 %v483_v48 }
 0x101   : > { %v843_v50 = vadd.f32 %v699_v29, %v687_v47  ;;  %v507_v52 = vsel %vm479_vm1, %v499_v49, 0.0 }
 0x102   : > { %487 = vadd.xlane.f32.xlu1 %v486_v51 }
 0x103   : > { %v489_v53 = vsel %vm479_vm1, %v843_v50, 0.0  ;;  %v500_v54 = vmul.f32 %v843_v50, %v843_v50 }
 0x104   : > { %508 = vadd.xlane.f32.xlu0 %v507_v52 }
 0x105   : > { %v510_v55 = vsel %vm479_vm1, %v500_v54, 0.0 }
 0x106   : > { %490 = vadd.xlane.f32.xlu1 %v489_v53 }
 0x10a   : > { %511 = vadd.xlane.f32.xlu1 %v510_v55 }
 0x181   : > { %v482_v56 = vpop.xlane.xlu0 %481 }
 0x182   : > { %v493_v57 = vmul.f32 0.0625, %v482_v56 }
 0x184   : > { %v517_v59 = vmul.f32 %v493_v57, %v493_v57  ;;  %v525_v19 = vsub.f32 %v825_v31, %v493_v57  ;;  %v543_v31 = vld [vmem:[%s185_s6 + $0x10] sm:$0xff] }
 0x185   : > { %v503_v58 = vpop.xlane.xlu0 %502 }
 0x186   : > { %v513_v60 = vmul.f32 0.0625, %v503_v58 }
 0x187   : > { %v506_v61 = vpop.xlane.xlu1 %505 }
 0x188   : > { %v521_v62 = vsub.f32 %v513_v60, %v517_v59  ;;  %v514_v3 = vmul.f32 0.0625, %v506_v61 }
 0x189   : > { %v485_v63 = vpop.xlane.xlu0 %484 }
 0x18a   : > { %v529_v0 = vadd.f32 1e-05, %v521_v62  ;;  %v494_v1 = vmul.f32 0.0625, %v485_v63 }
 0x18b   : > { %v488_v2 = vpop.xlane.xlu1 %487 }
 0x18c   : > { %735 = vrsqrt.f32 %v529_v0  ;;  %v518_v4 = vmul.f32 %v494_v1, %v494_v1  ;;  %v495_v5 = vmul.f32 0.0625, %v488_v2  ;;  %v526_v25 = vsub.f32 %v831_v38, %v494_v1 }
 0x18d   : > { %v509_v6 = vpop.xlane.xlu0 %508 }
 0x18e   : > { %v522_v7 = vsub.f32 %v514_v3, %v518_v4  ;;  %v519_v8 = vmul.f32 %v495_v5, %v495_v5  ;;  %v515_v9 = vmul.f32 0.0625, %v509_v6  ;;  %v527_v29 = vsub.f32 %v836_v44, %v495_v5 }
 0x18f   : > { %v491_v10 = vpop.xlane.xlu1 %490 }
 0x190   : > { %v530_v11 = vadd.f32 1e-05, %v522_v7  ;;  %v523_v12 = vsub.f32 %v515_v9, %v519_v8  ;;  %v496_v13 = vmul.f32 0.0625, %v491_v10 }
 0x192   : > { %737 = vrsqrt.f32 %v530_v11  ;;  %v531_v14 = vadd.f32 1e-05, %v523_v12  ;;  %v520_v16 = vmul.f32 %v496_v13, %v496_v13  ;;  %v528_v35 = vsub.f32 %v843_v50, %v496_v13 }
 0x193   : > { %v512_v15 = vpop.xlane.xlu1 %511 }
 0x194   : > { %739 = vrsqrt.f32 %v531_v14  ;;  %v516_v17 = vmul.f32 0.0625, %v512_v15 }
 0x196   : > { %v524_v18 = vsub.f32 %v516_v17, %v520_v16 }
 0x198   : > { %v532_v20 = vadd.f32 1e-05, %v524_v18 }
 0x199   : > { %v736_v21 = vpop.eup %735 }
 0x19a   : > { %v537_v23 = vmul.f32 %v736_v21, %v525_v19  ;;  %741 = vrsqrt.f32 %v532_v20 }
 0x19c   : > { %v545_v24 = vadd.f32 %v541_v22, %v537_v23 }
 0x19e   : > { %549 = vst.msk [vmem:[%s190_s9] sm:$0xff] %vm479_vm1, %v545_v24 }
 0x19f   : > { %v738_v26 = vpop.eup %737 }
 0x1a0   : > { %v538_v28 = vmul.f32 %v738_v26, %v526_v25 }
 0x1a1   : > { %v740_v30 = vpop.eup %739 }
 0x1a2   : > { %v546_v32 = vadd.f32 %v542_v27, %v538_v28  ;;  %v539_v33 = vmul.f32 %v740_v30, %v527_v29 }
 0x1a4   : > { %550 = vst.msk [vmem:[%s190_s9 + $0x8] sm:$0xff] %vm479_vm1, %v546_v32  ;;  %v547_v34 = vadd.f32 %v543_v31, %v539_v33 }
 0x1a6   : > { %551 = vst.msk [vmem:[%s190_s9 + $0x10] sm:$0xff] %vm479_vm1, %v547_v34 }
 0x1a7   : > { %v742_v36 = vpop.eup %741 }
 0x1a8   : > { %v540_v39 = vmul.f32 %v742_v36, %v528_v35 }
 0x1aa   : > { %v548_v38 = vadd.f32 %v544_v37, %v540_v39 }
 0x1ac   : > { %552 = vst.msk [vmem:[%s190_s9 + $0x18] sm:$0xff] %vm479_vm1, %v548_v38 }
 0x1ad PF: > { %s13_s12 = sadd.s32 1, %s749_s12  }
 0x1ae   : > { %p10_p4 = scmp.ge.s32.totalorder %s13_s12, 4  }
 0x1b0   :  { %12 = sbr.rel (!%p10_p4) target bundleno = 1 (0x1), region = 65 }

// kernel: transform_net_forward.19
= control target key start
LH: loop header
LB: loop body
LE: loop exit
PB: predicated region body
PF: predicated region fallthrough
CT: control target
= control target key end

     0   :  { %s700_s9 = smov 0   ;;  %s791_s0 = inlined_call_operand.vmem [shape: bf16[2,288,16], index: 0, kind: input, shape index: {}]   ;;  %s792_s1 = inlined_call_operand.vmem [shape: bf16[32,288], index: 1, kind: input, shape index: {}]   ;;  %s793_s2 = inlined_call_operand.vmem [shape: f32[2,32,16], index: 2, kind: output, shape index: {}]  }
   0x1 LB: > { %s557_s10 = sadd.s32 4294967295, %s683_s9   ;;  %p561_p0 = scmp.ge.s32.totalorder %s683_s9, 1  ;;  %s683_s9 = sphi %s700_s9, %s12_s9  }
   0x2   : > { %p112_p1 = scmp.lt.s32.totalorder %s683_s9, 3 }
   0x4   : > { %p113_p2 = pnand %p561_p0, %p112_p1 }
   0x5   : > { %p134_p3 = scmp.lt.s32.totalorder (!%p113_p2), %s557_s10, 1 }
   0x6   : > { %116 = sbr.rel (%p113_p2) target bundleno = 429 (0x1ad), region = 28 }
   0xb   : > { %vm327_vm0 = vcmask 261120   ;;  %v659_v0 = vld [vmem:[%s792_s1 + $0x8] ss:$12 sps:$4 sm:$0xff]   ;;  %s795_s10 = smov (!%p134_p3, %s557_s10), 1  ;;  %v665_v1 = vld [vmem:[%s792_s1 + $0x4] ss:$12 sps:$4 sm:$0xff]  }
   0xc   : > { %630 = vmatprep.mubr.msk.bf16.mxu1 %vm327_vm0, %v659_v0  ;;  %s634_s15 = smul.u32 144, %s795_s10  ;;  %366 = vmatprep.mubr.bf16.mxu0 %v665_v1  ;;  %v661_v15 = vld [vmem:[%s792_s1 + $0x20] ss:$12 sps:$4 sm:$0xff]   ;;  %v666_v22 = vld [vmem:[%s792_s1 + $0x1c] ss:$12 sps:$4 sm:$0xff]   ;;  %vm432_vm1 = vcmask 130048  }
   0xd   : > { %v663_v21 = vld [vmem:[%s792_s1] ss:$12 sps:$4 sm:$0xff]   ;;  %v668_v23 = vld [vmem:[%s792_s1 + $0x18] ss:$12 sps:$4 sm:$0xff]   ;;  %s593_s27 = sshll.u32 %s795_s10, 5 }
   0xe   : > { %s721_s18 = scalar_lea.vmem %s791_s0, %s634_s15  ;;  %s143_s30 = scalar_lea.vmem %s793_s2, %s593_s27 }
   0xf   : > { %v643_v2 = vld [vmem:[%s721_s18 + $0x78] sm:$0xff]   ;;  %v645_v4 = vld [vmem:[%s721_s18 + $0x70] sm:$0xff]   ;;  %v647_v6 = vld [vmem:[%s721_s18 + $0x68] sm:$0xff]  }
  0x10   : > { %v644_v3 = vld [vmem:[%s721_s18 + $0x38] sm:$0xff]   ;;  %594 = vmatprep.subr.bf16.mxu0 %v643_v2  ;;  %v646_v5 = vld [vmem:[%s721_s18 + $0x30] sm:$0xff]   ;;  %v648_v7 = vld [vmem:[%s721_s18 + $0x28] sm:$0xff]  }
  0x11   : > { %595 = vmatpush3.bf16.msra.mxu0 %v644_v3  ;;  %v649_v8 = vld [vmem:[%s721_s18 + $0x60] sm:$0xff]   ;;  %v654_v10 = vld [vmem:[%s721_s18 + $0x88] sm:$0xff]   ;;  %v651_v11 = vld [vmem:[%s721_s18 + $0x58] sm:$0xff]  }
  0x12   : > { %596 = vmatprep.subr.bf16.mxu0 %v645_v4  ;;  %v650_v9 = vld [vmem:[%s721_s18 + $0x20] sm:$0xff]   ;;  %626 = vmatprep.subr.bf16.mxu1 %v654_v10  ;;  %v652_v13 = vld [vmem:[%s721_s18 + $0x18] sm:$0xff]   ;;  %v653_v14 = vld [vmem:[%s721_s18 + $0x50] sm:$0xff]  }
  0x13   : > { %627 = vmatpush3.bf16.msra.mxu1 %v654_v10  ;;  %v657_v12 = vld [vmem:[%s721_s18 + $0x80] sm:$0xff]   ;;  %v655_v16 = vld [vmem:[%s721_s18 + $0x10] sm:$0xff]   ;;  %v656_v17 = vld [vmem:[%s721_s18 + $0x48] sm:$0xff]  }
  0x14   : > { %628 = vmatprep.subr.bf16.mxu1 %v657_v12  ;;  %v658_v18 = vld [vmem:[%s721_s18 + $0x8] sm:$0xff]   ;;  %v660_v19 = vld [vmem:[%s721_s18 + $0x40] sm:$0xff]  }
  0x15   : > { %597 = vmatpush3.bf16.msra.mxu0 %v646_v5  ;;  %v662_v20 = vld [vmem:[%s721_s18] sm:$0xff]  }
  0x16   : > { %598 = vmatprep.subr.bf16.mxu0 %v647_v6 }
  0x17   : > { %629 = vmatpush3.bf16.msra.mxu1 %v657_v12 }
  0x19   : > { %599 = vmatpush3.bf16.msra.mxu0 %v648_v7 }
  0x1a   : > { %600 = vmatprep.subr.bf16.mxu0 %v649_v8  ;;  %631 = vmatmul.mubr.msk.bf16.vlgmr.msra.gmra.mxu1 %vm327_vm0, %v661_v15 }
  0x1d   : > { %601 = vmatpush3.bf16.msra.mxu0 %v650_v9 }
  0x1e   : > { %602 = vmatprep.subr.bf16.mxu0 %v651_v11 }
  0x21   : > { %603 = vmatpush3.bf16.msra.mxu0 %v652_v13 }
  0x22   : > { %604 = vmatprep.subr.bf16.mxu0 %v653_v14 }
  0x25   : > { %605 = vmatpush3.bf16.msra.mxu0 %v655_v16 }
  0x26   : > { %606 = vmatprep.subr.bf16.mxu0 %v656_v17 }
  0x29   : > { %607 = vmatpush3.bf16.msra.mxu0 %v658_v18 }
  0x2a   : > { %608 = vmatprep.subr.bf16.mxu0 %v660_v19 }
  0x2d   : > { %609 = vmatpush3.bf16.msra.mxu0 %v662_v20 }
  0x30   : > { %367 = vmatmul.mubr.bf16.vlgmr.msra.gmra.mxu0 %v663_v21 }
  0x31   : > { %374 = vmatprep.mubr.bf16.mxu0 %v666_v22 }
  0x38   : > { %375 = vmatmul.mubr.bf16.gmra.mxu0 %v668_v23 }
  0xda   : > { %v632_v24 = vpop.f32.mrf.mxu1 }
  0xdc   : > { %v417_v25 = vpop.f32.mrf.mxu1 }
  0xde   : > { %v633_v29 = vpop.f32.mrf.mxu1 }
  0xe0   : > { %v420_v36 = vpop.f32.mrf.mxu1 }
  0xf0   : > { %v610_v26 = vpop.f32.mrf.mxu0 }
  0xf2   : > { %v611_v27 = vpop.f32.mrf.mxu0 }
  0xf3   : > { %v612_v28 = vadd.f32 %v611_v27, %v610_v26 }
  0xf4   : > { %v613_v30 = vpop.f32.mrf.mxu0 }
  0xf5   : > { %v754_v31 = vadd.f32 %v612_v28, %v417_v25 }
  0xf6   : > { %v614_v32 = vpop.f32.mrf.mxu0 }
  0xf7   : > { %v615_v33 = vadd.f32 %v614_v32, %v613_v30  ;;  %v433_v34 = vsel %vm432_vm1, %v754_v31, 0.0  ;;  %v450_v35 = vmul.f32 %v754_v31, %v754_v31 }
  0xf8   : > { %v616_v37 = vpop.f32.mrf.mxu0  ;;  %434 = vadd.xlane.f32.xlu0 %v433_v34 }
  0xf9   : > { %v760_v38 = vadd.f32 %v615_v33, %v420_v36  ;;  %v454_v41 = vsel %vm432_vm1, %v450_v35, 0.0 }
  0xfa   : > { %v617_v39 = vpop.f32.mrf.mxu0 }
  0xfb   : > { %v618_v40 = vadd.f32 %v617_v39, %v616_v37  ;;  %v451_v42 = vmul.f32 %v760_v38, %v760_v38  ;;  %v436_v48 = vsel %vm432_vm1, %v760_v38, 0.0 }
  0xfc   : > { %v619_v43 = vpop.f32.mrf.mxu0  ;;  %455 = vadd.xlane.f32.xlu0 %v454_v41 }
  0xfd   : > { %v765_v44 = vadd.f32 %v632_v24, %v618_v40  ;;  %v457_v45 = vsel %vm432_vm1, %v451_v42, 0.0 }
  0xfe   : > { %v620_v46 = vpop.f32.mrf.mxu0  ;;  %458 = vadd.xlane.f32.xlu1 %v457_v45 }
  0xff   : > { %v621_v47 = vadd.f32 %v620_v46, %v619_v43  ;;  %v452_v49 = vmul.f32 %v765_v44, %v765_v44  ;;  %v439_v51 = vsel %vm432_vm1, %v765_v44, 0.0 }
 0x100   : > { %437 = vadd.xlane.f32.xlu0 %v436_v48 }
 0x101   : > { %v429_v50 = vadd.f32 %v633_v29, %v621_v47  ;;  %v460_v52 = vsel %vm432_vm1, %v452_v49, 0.0 }
 0x102   : > { %440 = vadd.xlane.f32.xlu1 %v439_v51 }
 0x103   : > { %v442_v53 = vsel %vm432_vm1, %v429_v50, 0.0  ;;  %v453_v54 = vmul.f32 %v429_v50, %v429_v50 }
 0x104   : > { %461 = vadd.xlane.f32.xlu0 %v460_v52 }
 0x105   : > { %v463_v55 = vsel %vm432_vm1, %v453_v54, 0.0 }
 0x106   : > { %443 = vadd.xlane.f32.xlu1 %v442_v53 }
 0x10a   : > { %464 = vadd.xlane.f32.xlu1 %v463_v55 }
 0x181   : > { %v435_v56 = vpop.xlane.xlu0 %434 }
 0x182   : > { %v446_v57 = vmul.f32 0.0625, %v435_v56 }
 0x184   : > { %v470_v59 = vmul.f32 %v446_v57, %v446_v57  ;;  %v478_v19 = vsub.f32 %v754_v31, %v446_v57 }
 0x185   : > { %v456_v58 = vpop.xlane.xlu0 %455 }
 0x186   : > { %v466_v60 = vmul.f32 0.0625, %v456_v58 }
 0x187   : > { %v459_v61 = vpop.xlane.xlu1 %458 }
 0x188   : > { %v474_v62 = vsub.f32 %v466_v60, %v470_v59  ;;  %v467_v3 = vmul.f32 0.0625, %v459_v61 }
 0x189   : > { %v438_v63 = vpop.xlane.xlu0 %437 }
 0x18a   : > { %v482_v0 = vadd.f32 1e-05, %v474_v62  ;;  %v447_v1 = vmul.f32 0.0625, %v438_v63 }
 0x18b   : > { %v441_v2 = vpop.xlane.xlu1 %440 }
 0x18c   : > { %669 = vrsqrt.f32 %v482_v0  ;;  %v471_v4 = vmul.f32 %v447_v1, %v447_v1  ;;  %v448_v5 = vmul.f32 0.0625, %v441_v2  ;;  %v479_v24 = vsub.f32 %v760_v38, %v447_v1 }
 0x18d   : > { %v462_v6 = vpop.xlane.xlu0 %461 }
 0x18e   : > { %v475_v7 = vsub.f32 %v467_v3, %v471_v4  ;;  %v472_v8 = vmul.f32 %v448_v5, %v448_v5  ;;  %v468_v9 = vmul.f32 0.0625, %v462_v6  ;;  %v480_v27 = vsub.f32 %v765_v44, %v448_v5 }
 0x18f   : > { %v444_v10 = vpop.xlane.xlu1 %443 }
 0x190   : > { %v483_v11 = vadd.f32 1e-05, %v475_v7  ;;  %v476_v12 = vsub.f32 %v468_v9, %v472_v8  ;;  %v449_v13 = vmul.f32 0.0625, %v444_v10 }
 0x192   : > { %671 = vrsqrt.f32 %v483_v11  ;;  %v484_v14 = vadd.f32 1e-05, %v476_v12  ;;  %v473_v16 = vmul.f32 %v449_v13, %v449_v13  ;;  %v481_v32 = vsub.f32 %v429_v50, %v449_v13 }
 0x193   : > { %v465_v15 = vpop.xlane.xlu1 %464 }
 0x194   : > { %673 = vrsqrt.f32 %v484_v14  ;;  %v469_v17 = vmul.f32 0.0625, %v465_v15 }
 0x196   : > { %v477_v18 = vsub.f32 %v469_v17, %v473_v16 }
 0x198   : > { %v485_v20 = vadd.f32 1e-05, %v477_v18 }
 0x199   : > { %v670_v21 = vpop.eup %669 }
 0x19a   : > { %v490_v22 = vmul.f32 %v670_v21, %v478_v19  ;;  %675 = vrsqrt.f32 %v485_v20 }
 0x19c   : > { %v494_v23 = vmax.f32 %v490_v22, 0.0 }
 0x19e   : > { %498 = vst.msk [vmem:[%s143_s30] sm:$0xff] %vm432_vm1, %v494_v23 }
 0x19f   : > { %v672_v25 = vpop.eup %671 }
 0x1a0   : > { %v491_v26 = vmul.f32 %v672_v25, %v479_v24 }
 0x1a1   : > { %v674_v28 = vpop.eup %673 }
 0x1a2   : > { %v495_v29 = vmax.f32 %v491_v26, 0.0  ;;  %v492_v30 = vmul.f32 %v674_v28, %v480_v27 }
 0x1a4   : > { %499 = vst.msk [vmem:[%s143_s30 + $0x8] sm:$0xff] %vm432_vm1, %v495_v29  ;;  %v496_v31 = vmax.f32 %v492_v30, 0.0 }
 0x1a6   : > { %500 = vst.msk [vmem:[%s143_s30 + $0x10] sm:$0xff] %vm432_vm1, %v496_v31 }
 0x1a7   : > { %v676_v33 = vpop.eup %675 }
 0x1a8   : > { %v493_v34 = vmul.f32 %v676_v33, %v481_v32 }
 0x1aa   : > { %v497_v35 = vmax.f32 %v493_v34, 0.0 }
 0x1ac   : > { %501 = vst.msk [vmem:[%s143_s30 + $0x18] sm:$0xff] %vm432_vm1, %v497_v35 }
 0x1ad PF: > { %s12_s9 = sadd.s32 1, %s683_s9  }
 0x1ae   : > { %p9_p4 = scmp.ge.s32.totalorder %s12_s9, 4  }
 0x1b0   :  { %11 = sbr.rel (!%p9_p4) target bundleno = 1 (0x1), region = 58 }

// kernel: transform_net_forward.29
= control target key start
LH: loop header
LB: loop body
LE: loop exit
PB: predicated region body
PF: predicated region fallthrough
CT: control target
= control target key end

     0   :  { %s613_s9 = smov 0   ;;  %s669_s0 = inlined_call_operand.vmem [shape: bf16[2,288,64], index: 0, kind: input, shape index: {}]   ;;  %s670_s1 = inlined_call_operand.vmem [shape: bf16[16,288], index: 1, kind: input, shape index: {}]   ;;  %s671_s2 = inlined_call_operand.vmem [shape: f32[2,16,64], index: 2, kind: output, shape index: {}]  }
   0x1 LB: > { %s485_s10 = sadd.s32 4294967295, %s594_s9   ;;  %p489_p0 = scmp.ge.s32.totalorder %s594_s9, 1  ;;  %s594_s9 = sphi %s613_s9, %s12_s9  }
   0x2   : > { %p112_p1 = scmp.lt.s32.totalorder %s594_s9, 3 }
   0x4   : > { %p113_p2 = pnand %p489_p0, %p112_p1 }
   0x5   : > { %p134_p3 = scmp.lt.s32.totalorder (!%p113_p2), %s485_s10, 1 }
   0x6   : > { %116 = sbr.rel (%p113_p2) target bundleno = 417 (0x1a1), region = 28 }
   0xb   : > { %v596_v0 = vmov 0.0   ;;  %vm597_vm0 = vmmov 0   ;;  %s673_s10 = smov (!%p134_p3, %s485_s10), 1  ;;  %v583_v1 = vld [vmem:[%s670_s1 + $0x4] ss:$12 sps:$4 sm:$0xff]   ;;  %vm308_vm1 = vcmask 261120  }
   0xc   : > { %543 = vmatprep.subr.bf16.mxu1 %v596_v0  ;;  %547 = vmatprep.mubr.msk.bf16.mxu1 %vm597_vm0, %v596_v0  ;;  %s551_s13 = smul.u32 144, %s673_s10  ;;  %v580_v15 = vld [vmem:[%s670_s1 + $0x8] ss:$12 sps:$4 sm:$0xff]   ;;  %v581_v21 = vld [vmem:[%s670_s1] ss:$12 sps:$4 sm:$0xff]   ;;  %vm394_vm2 = vcmask 523264  }
   0xd   : > { %344 = vmatprep.mubr.bf16.mxu0 %v583_v1  ;;  %s517_s21 = sshll.u32 %s673_s10, 4 }
   0xe   : > { %s630_s16 = scalar_lea.vmem %s669_s0, %s551_s13  ;;  %s143_s24 = scalar_lea.vmem %s671_s2, %s517_s21 }
   0xf   : > { %v562_v2 = vld [vmem:[%s630_s16 + $0x78] sm:$0xff]   ;;  %v564_v4 = vld [vmem:[%s630_s16 + $0x70] sm:$0xff]   ;;  %v566_v6 = vld [vmem:[%s630_s16 + $0x68] sm:$0xff]  }
  0x10   : > { %v563_v3 = vld [vmem:[%s630_s16 + $0x38] sm:$0xff]   ;;  %518 = vmatprep.subr.bf16.mxu0 %v562_v2  ;;  %v565_v5 = vld [vmem:[%s630_s16 + $0x30] sm:$0xff]   ;;  %v567_v7 = vld [vmem:[%s630_s16 + $0x28] sm:$0xff]  }
  0x11   : > { %519 = vmatpush3.bf16.msra.mxu0 %v563_v3  ;;  %v568_v8 = vld [vmem:[%s630_s16 + $0x60] sm:$0xff]   ;;  %v570_v10 = vld [vmem:[%s630_s16 + $0x58] sm:$0xff]   ;;  %v574_v11 = vld [vmem:[%s630_s16 + $0x88] sm:$0xff]  }
  0x12   : > { %520 = vmatprep.subr.bf16.mxu0 %v564_v4  ;;  %v569_v9 = vld [vmem:[%s630_s16 + $0x20] sm:$0xff]   ;;  %v571_v12 = vld [vmem:[%s630_s16 + $0x18] sm:$0xff]   ;;  %544 = vmatpush3.bf16.msra.mxu1 %v574_v11  ;;  %v572_v14 = vld [vmem:[%s630_s16 + $0x50] sm:$0xff]  }
  0x13   : > { %545 = vmatprep.subr.bf16.mxu1 %v596_v0  ;;  %v577_v13 = vld [vmem:[%s630_s16 + $0x80] sm:$0xff]   ;;  %v573_v16 = vld [vmem:[%s630_s16 + $0x10] sm:$0xff]   ;;  %v575_v17 = vld [vmem:[%s630_s16 + $0x48] sm:$0xff]  }
  0x14   : > { %v576_v18 = vld [vmem:[%s630_s16 + $0x8] sm:$0xff]   ;;  %v578_v19 = vld [vmem:[%s630_s16 + $0x40] sm:$0xff]  }
  0x15   : > { %521 = vmatpush3.bf16.msra.mxu0 %v565_v5  ;;  %v579_v20 = vld [vmem:[%s630_s16] sm:$0xff]  }
  0x16   : > { %522 = vmatprep.subr.bf16.mxu0 %v566_v6  ;;  %546 = vmatpush3.bf16.msra.mxu1 %v577_v13 }
  0x19   : > { %523 = vmatpush3.bf16.msra.mxu0 %v567_v7  ;;  %548 = vmatmul.mubr.msk.bf16.vlgmr.msra.gmra.mxu1 %vm308_vm1, %v580_v15 }
  0x1a   : > { %524 = vmatprep.subr.bf16.mxu0 %v568_v8 }
  0x1d   : > { %525 = vmatpush3.bf16.msra.mxu0 %v569_v9 }
  0x1e   : > { %526 = vmatprep.subr.bf16.mxu0 %v570_v10 }
  0x21   : > { %527 = vmatpush3.bf16.msra.mxu0 %v571_v12 }
  0x22   : > { %528 = vmatprep.subr.bf16.mxu0 %v572_v14 }
  0x25   : > { %529 = vmatpush3.bf16.msra.mxu0 %v573_v16 }
  0x26   : > { %530 = vmatprep.subr.bf16.mxu0 %v575_v17 }
  0x29   : > { %531 = vmatpush3.bf16.msra.mxu0 %v576_v18 }
  0x2a   : > { %532 = vmatprep.subr.bf16.mxu0 %v578_v19 }
  0x2d   : > { %533 = vmatpush3.bf16.msra.mxu0 %v579_v20 }
  0x30   : > { %345 = vmatmul.mubr.bf16.vlgmr.msra.gmra.mxu0 %v581_v21 }
  0xd9   : > { %v387_v22 = vpop.f32.mrf.mxu1 }
  0xdb   : > { %v549_v23 = vpop.f32.mrf.mxu1 }
  0xdd   : > { %v390_v24 = vpop.f32.mrf.mxu1 }
  0xdf   : > { %v550_v25 = vpop.f32.mrf.mxu1 }
  0xf0   : > { %v534_v26 = vpop.f32.mrf.mxu0 }
  0xf2   : > { %v535_v27 = vpop.f32.mrf.mxu0 }
  0xf3   : > { %v536_v28 = vadd.f32 %v535_v27, %v534_v26 }
  0xf4   : > { %v537_v29 = vpop.f32.mrf.mxu0 }
  0xf5   : > { %v388_v30 = vadd.f32 %v536_v28, %v387_v22 }
  0xf6   : > { %v538_v31 = vpop.f32.mrf.mxu0 }
  0xf7   : > { %v539_v32 = vadd.f32 %v538_v31, %v537_v29  ;;  %v395_v33 = vsel %vm394_vm2, %v388_v30, 0.0  ;;  %v404_v34 = vmul.f32 %v388_v30, %v388_v30 }
  0xf8   : > { %396 = vadd.xlane.f32.xlu0 %v395_v33 }
  0xf9   : > { %v391_v35 = vadd.f32 %v539_v32, %v390_v24  ;;  %v406_v36 = vsel %vm394_vm2, %v404_v34, 0.0 }
  0xfa   : > { %407 = vadd.xlane.f32.xlu1 %v406_v36 }
  0xfb   : > { %v398_v37 = vsel %vm394_vm2, %v391_v35, 0.0  ;;  %v405_v38 = vmul.f32 %v391_v35, %v391_v35 }
  0xfc   : > { %399 = vadd.xlane.f32.xlu0 %v398_v37 }
  0xfd   : > { %v409_v39 = vsel %vm394_vm2, %v405_v38, 0.0 }
  0xfe   : > { %410 = vadd.xlane.f32.xlu1 %v409_v39 }
 0x181   : > { %v397_v40 = vpop.xlane.xlu0 %396 }
 0x182   : > { %v402_v41 = vmul.f32 0.015625, %v397_v40 }
 0x183   : > { %v408_v42 = vpop.xlane.xlu1 %407 }
 0x184   : > { %v414_v43 = vmul.f32 %v402_v41, %v402_v41  ;;  %v412_v44 = vmul.f32 0.015625, %v408_v42  ;;  %v418_v54 = vsub.f32 %v388_v30, %v402_v41 }
 0x185   : > { %v400_v45 = vpop.xlane.xlu0 %399 }
 0x186   : > { %v416_v46 = vsub.f32 %v412_v44, %v414_v43  ;;  %v403_v47 = vmul.f32 0.015625, %v400_v45 }
 0x187   : > { %v411_v48 = vpop.xlane.xlu1 %410 }
 0x188   : > { %v420_v49 = vadd.f32 1e-05, %v416_v46  ;;  %v415_v50 = vmul.f32 %v403_v47, %v403_v47  ;;  %v413_v51 = vmul.f32 0.015625, %v411_v48  ;;  %v419_v58 = vsub.f32 %v391_v35, %v403_v47 }
 0x18a   : > { %584 = vrsqrt.f32 %v420_v49  ;;  %v417_v52 = vsub.f32 %v413_v51, %v415_v50 }
 0x18c   : > { %v421_v53 = vadd.f32 1e-05, %v417_v52 }
 0x18e   : > { %586 = vrsqrt.f32 %v421_v53 }
 0x197   : > { %v585_v55 = vpop.eup %584 }
 0x198   : > { %v424_v56 = vmul.f32 %v585_v55, %v418_v54 }
 0x19a   : > { %v426_v57 = vmax.f32 %v424_v56, 0.0 }
 0x19b   : > { %v587_v59 = vpop.eup %586 }
 0x19c   : > { %428 = vst.msk [vmem:[%s143_s24] sm:$0xff] %vm394_vm2, %v426_v57  ;;  %v425_v60 = vmul.f32 %v587_v59, %v419_v58 }
 0x19e   : > { %v427_v61 = vmax.f32 %v425_v60, 0.0 }
 0x1a0   : > { %429 = vst.msk [vmem:[%s143_s24 + $0x8] sm:$0xff] %vm394_vm2, %v427_v61 }
 0x1a1 PF: > { %s12_s9 = sadd.s32 1, %s594_s9  }
 0x1a2   : > { %p9_p4 = scmp.ge.s32.totalorder %s12_s9, 4  }
 0x1a4   :  { %11 = sbr.rel (!%p9_p4) target bundleno = 1 (0x1), region = 58 }

// kernel: transform_net_forward.30
= control target key start
LH: loop header
LB: loop body
LE: loop exit
PB: predicated region body
PF: predicated region fallthrough
CT: control target
= control target key end

     0   :  { %s478_s9 = smov 0   ;;  %s522_s0 = inlined_call_operand.vmem [shape: bf16[2,144,256], index: 0, kind: input, shape index: {}]   ;;  %s523_s1 = inlined_call_operand.vmem [shape: bf16[8,144], index: 1, kind: input, shape index: {}]   ;;  %s524_s2 = inlined_call_operand.vmem [shape: f32[2,8,256], index: 2, kind: output, shape index: {}]  }
   0x1 LB: > { %s383_s10 = sadd.s32 4294967295, %s461_s9   ;;  %p387_p0 = scmp.ge.s32.totalorder %s461_s9, 1  ;;  %s461_s9 = sphi %s478_s9, %s12_s9  }
   0x2   : > { %p112_p1 = scmp.lt.s32.totalorder %s461_s9, 3 }
   0x4   : > { %p113_p2 = pnand %p387_p0, %p112_p1 }
   0x5   : > { %p134_p3 = scmp.lt.s32.totalorder (!%p113_p2), %s383_s10, 1 }
   0x6   : > { %116 = sbr.rel (%p113_p2) target bundleno = 416 (0x1a0), region = 28 }
   0xb   : > { %v145_v0 = vld [vmem:[%s523_s1] sm:$0xff]  ;;  %vm260_vm0 = vcmask 130048   ;;  %s526_s10 = smov (!%p134_p3, %s383_s10), 1 }
   0xc   : > { %v392_v1 = vcombine.high %v145_v0, %v145_v0  ;;  %s415_s13 = smul.u32 144, %s526_s10  ;;  %v391_v20 = vcombine.low %v145_v0, %v145_v0  ;;  %s414_s17 = sshll.u32 %s526_s10, 4 }
   0xd   : > { %s143_s20 = scalar_lea.vmem %s524_s2, %s414_s17 }
   0xe   : > { %411 = vmatprep.mubr.msk.bf16.mxu0 %vm260_vm0, %v392_v1  ;;  %s495_s16 = scalar_lea.vmem %s522_s0, %s415_s13 }
   0xf   : > { %v424_v2 = vld [vmem:[%s495_s16 + $0x74] ss:$8 sps:$4 sm:$0xff]   ;;  %v426_v3 = vld [vmem:[%s495_s16 + $0x70] ss:$8 sps:$4 sm:$0xff]   ;;  %v427_v4 = vld [vmem:[%s495_s16 + $0x64] ss:$8 sps:$4 sm:$0xff]  }
  0x10   : > { %264 = vmatprep.subr.bf16.mxu0 %v424_v2  ;;  %v429_v5 = vld [vmem:[%s495_s16 + $0x60] ss:$8 sps:$4 sm:$0xff]   ;;  %v430_v6 = vld [vmem:[%s495_s16 + $0x54] ss:$8 sps:$4 sm:$0xff]   ;;  %v432_v7 = vld [vmem:[%s495_s16 + $0x50] ss:$8 sps:$4 sm:$0xff]  }
  0x11   : > { %265 = vmatpush1.bf16.msra.mxu0 %v426_v3  ;;  %v433_v8 = vld [vmem:[%s495_s16 + $0x44] ss:$8 sps:$4 sm:$0xff]   ;;  %v435_v9 = vld [vmem:[%s495_s16 + $0x40] ss:$8 sps:$4 sm:$0xff]   ;;  %v436_v10 = vld [vmem:[%s495_s16 + $0x34] ss:$8 sps:$4 sm:$0xff]  }
  0x12   : > { %266 = vmatprep.subr.bf16.mxu0 %v427_v4  ;;  %v438_v11 = vld [vmem:[%s495_s16 + $0x30] ss:$8 sps:$4 sm:$0xff]   ;;  %v439_v12 = vld [vmem:[%s495_s16 + $0x24] ss:$8 sps:$4 sm:$0xff]   ;;  %v441_v13 = vld [vmem:[%s495_s16 + $0x20] ss:$8 sps:$4 sm:$0xff]  }
  0x13   : > { %v442_v14 = vld [vmem:[%s495_s16 + $0x14] ss:$8 sps:$4 sm:$0xff]   ;;  %v444_v15 = vld [vmem:[%s495_s16 + $0x10] ss:$8 sps:$4 sm:$0xff]   ;;  %v445_v16 = vld [vmem:[%s495_s16 + $0x4] ss:$8 sps:$4 sm:$0xff]  }
  0x14   : > { %v447_v17 = vld [vmem:[%s495_s16] ss:$8 sps:$4 sm:$0xff]   ;;  %v448_v18 = vld [vmem:[%s495_s16 + $0x84] ss:$8 sps:$4 sm:$0xff]  }
  0x15   : > { %267 = vmatpush1.bf16.msra.mxu0 %v429_v5  ;;  %v450_v19 = vld [vmem:[%s495_s16 + $0x80] ss:$8 sps:$4 sm:$0xff]  }
  0x16   : > { %268 = vmatprep.subr.bf16.mxu0 %v430_v6 }
  0x19   : > { %269 = vmatpush1.bf16.msra.mxu0 %v432_v7 }
  0x1a   : > { %270 = vmatprep.subr.bf16.mxu0 %v433_v8 }
  0x1d   : > { %271 = vmatpush1.bf16.msra.mxu0 %v435_v9 }
  0x1e   : > { %272 = vmatprep.subr.bf16.mxu0 %v436_v10 }
  0x21   : > { %273 = vmatpush1.bf16.msra.mxu0 %v438_v11 }
  0x22   : > { %274 = vmatprep.subr.bf16.mxu0 %v439_v12 }
  0x25   : > { %275 = vmatpush1.bf16.msra.mxu0 %v441_v13 }
  0x26   : > { %276 = vmatprep.subr.bf16.mxu0 %v442_v14 }
  0x29   : > { %277 = vmatpush1.bf16.msra.mxu0 %v444_v15 }
  0x2a   : > { %278 = vmatprep.subr.bf16.mxu0 %v445_v16 }
  0x2d   : > { %279 = vmatpush1.bf16.msra.mxu0 %v447_v17 }
  0x2e   : > { %294 = vmatprep.subr.bf16.mxu0 %v448_v18 }
  0x31   : > { %295 = vmatpush2.bf16.msra.mxu0 %v450_v19 }
  0x34   : > { %297 = vmatmul.mubr.bf16.vlgmr.msra.gmra.mxu0 %v391_v20 }
  0xf4   : > { %v298_v21 = vpop.f32.mrf.mxu0 }
  0xf5   : > { %v310_v26 = vmul.f32 %v298_v21, %v298_v21 }
  0xf6   : > { %v300_v22 = vpop.f32.mrf.mxu0 }
  0xf7   : > { %v305_v23 = vadd.f32 %v300_v22, %v298_v21  ;;  %v311_v24 = vmul.f32 %v300_v22, %v300_v22 }
  0xf8   : > { %v302_v25 = vpop.f32.mrf.mxu0 }
  0xf9   : > { %306 = vadd.xlane.f32.xlu0 %v305_v23  ;;  %v312_v28 = vadd.f32 %v311_v24, %v310_v26 }
  0xfa   : > { %v303_v27 = vpop.f32.mrf.mxu0 }
  0xfd   : > { %313 = vadd.xlane.f32.xlu0 %v312_v28 }
 0x182   : > { %v307_v29 = vpop.xlane.xlu0 %306 }
 0x183   : > { %v309_v30 = vmul.f32 0.00390625, %v307_v29 }
 0x185   : > { %v316_v32 = vmul.f32 %v309_v30, %v309_v30  ;;  %v318_v36 = vsub.f32 %v298_v21, %v309_v30  ;;  %v319_v37 = vsub.f32 %v300_v22, %v309_v30 }
 0x186   : > { %v314_v31 = vpop.xlane.xlu0 %313 }
 0x187   : > { %v315_v33 = vmul.f32 0.00390625, %v314_v31 }
 0x189   : > { %v317_v34 = vsub.f32 %v315_v33, %v316_v32 }
 0x18b   : > { %v320_v35 = vadd.f32 1e-05, %v317_v34 }
 0x18d   : > { %453 = vrsqrt.f32 %v320_v35 }
 0x19a   : > { %v454_v38 = vpop.eup %453 }
 0x19b   : > { %v322_v39 = vmul.f32 %v454_v38, %v318_v36  ;;  %v323_v40 = vmul.f32 %v454_v38, %v319_v37 }
 0x19d   : > { %v324_v41 = vmax.f32 %v322_v39, 0.0  ;;  %v325_v42 = vmax.f32 %v323_v40, 0.0 }
 0x19f   : > { %326 = vst [vmem:[%s143_s20] sm:$0xff] %v324_v41  ;;  %327 = vst [vmem:[%s143_s20 + $0x8] sm:$0xff] %v325_v42 }
 0x1a0 PF: > { %s12_s9 = sadd.s32 1, %s461_s9  }
 0x1a1   : > { %p9_p4 = scmp.ge.s32.totalorder %s12_s9, 4  }
 0x1a3   :  { %11 = sbr.rel (!%p9_p4) target bundleno = 1 (0x1), region = 58 }

// kernel: transform_net_forward.31
= control target key start
LH: loop header
LB: loop body
LE: loop exit
PB: predicated region body
PF: predicated region fallthrough
CT: control target
= control target key end

     0   :  { %s1153_s12 = smov 0   ;;  %s1276_s0 = inlined_call_operand.vmem [shape: bf16[2,648,256], index: 0, kind: input, shape index: {}]   ;;  %s1277_s1 = inlined_call_operand.vmem [shape: bf16[3,648], index: 1, kind: input, shape index: {}]   ;;  %s1278_s2 = inlined_call_operand.vmem [shape: f32[3,1], index: 2, kind: input, shape index: {}]   ;;  %s1279_s3 = inlined_call_operand.vmem [shape: f32[2,3,256], index: 3, kind: output, shape index: {}]  }
   0x1 LB: > { %s892_s13 = sadd.s32 4294967295, %s1129_s12   ;;  %p896_p0 = scmp.ge.s32.totalorder %s1129_s12, 1  ;;  %s1129_s12 = sphi %s1153_s12, %s13_s12  }
   0x2   : > { %p137_p1 = scmp.lt.s32.totalorder %s1129_s12, 3 }
   0x4   : > { %p138_p2 = pnand %p896_p0, %p137_p1 }
   0x5   : > { %p161_p3 = scmp.lt.s32.totalorder (!%p138_p2), %s892_s13, 1 }
   0x6   : > { %141 = sbr.rel (%p138_p2) target bundleno = 316 (0x13c), region = 32 }
   0xb   : > { %v172_v0 = vld [vmem:[%s1277_s1] sm:$0xff]  ;;  %v267_v1 = vlaneseq  ;;  %v1131_v2 = vmov 1983009808   ;;  %s1281_s13 = smov (!%p161_p3, %s892_s13), 1  ;;  %v1132_v5 = vmov 0   ;;  %vm698_vm0 = vcmask 64512  }
   0xc   : > { %v265_v3 = vunpack.c.l.s4 %v1131_v2  ;;  %999 = vset.pattern.permute.xlu0 %v1132_v5  ;;  %v255_v6 = vld [vmem:[%s1278_s2] sm:$0x7]  ;;  %v263_v8 = vcombine.high %v172_v0, %v172_v0  ;;  %s988_s18 = smul.u32 648, %s1281_s13  ;;  %vm702_vm1 = vcmask 1043456   ;;  %s987_s24 = sshll.u32 %s1281_s13, 3 }
   0xd   : > { %v268_v4 = vshrl.u32 %v267_v1, 7  ;;  %258 = vperm.xlu0 %999, %v255_v6   ;;  %s170_s27 = scalar_lea.vmem %s1279_s3, %s987_s24 }
   0xe   : > { %v266_v7 = vunpack.c.0.s8 %v265_v3  ;;  %s1173_s21 = scalar_lea.vmem %s1276_s0, %s988_s18 }
   0xf   : > { %v1000_v10 = vld [vmem:[%s1173_s21 + $0x74] ss:$8 sps:$4 sm:$0xff]   ;;  %v1002_v13 = vld [vmem:[%s1173_s21 + $0x70] ss:$8 sps:$4 sm:$0xff]   ;;  %v1006_v18 = vld [vmem:[%s1173_s21 + $0x64] ss:$8 sps:$4 sm:$0xff]  }
  0x10   : > { %v269_v9 = vsub.s32 %v266_v7, %v268_v4  ;;  %709 = vmatprep.subr.bf16.mxu0 %v1000_v10  ;;  %v1003_v14 = vld [vmem:[%s1173_s21 + $0x174] ss:$8 sps:$4 sm:$0xff]   ;;  %v1005_v15 = vld [vmem:[%s1173_s21 + $0x170] ss:$8 sps:$4 sm:$0xff]   ;;  %v1008_v19 = vld [vmem:[%s1173_s21 + $0x60] ss:$8 sps:$4 sm:$0xff]  }
  0x11   : > { %710 = vmatpush1.bf16.msra.mxu0 %v1002_v13  ;;  %750 = vmatprep.subr.bf16.mxu1 %v1003_v14  ;;  %v1009_v20 = vld [vmem:[%s1173_s21 + $0x164] ss:$8 sps:$4 sm:$0xff]   ;;  %v1011_v21 = vld [vmem:[%s1173_s21 + $0x160] ss:$8 sps:$4 sm:$0xff]   ;;  %v1012_v22 = vld [vmem:[%s1173_s21 + $0x54] ss:$8 sps:$4 sm:$0xff]  }
  0x12   : > { %v1176_v11 = vrot.slane %v172_v0, %v269_v9  ;;  %v1178_v12 = vrot.slane %v263_v8, %v269_v9  ;;  %751 = vmatpush1.bf16.msra.mxu1 %v1005_v15  ;;  %711 = vmatprep.subr.bf16.mxu0 %v1006_v18  ;;  %v1014_v23 = vld [vmem:[%s1173_s21 + $0x50] ss:$8 sps:$4 sm:$0xff]   ;;  %v1015_v24 = vld [vmem:[%s1173_s21 + $0x154] ss:$8 sps:$4 sm:$0xff]   ;;  %v1018_v25 = vld [vmem:[%s1173_s21 + $0x44] ss:$8 sps:$4 sm:$0xff]  }
  0x13   : > { %752 = vmatprep.subr.bf16.mxu1 %v1009_v20  ;;  %v1017_v26 = vld [vmem:[%s1173_s21 + $0x150] ss:$8 sps:$4 sm:$0xff]   ;;  %v1021_v27 = vld [vmem:[%s1173_s21 + $0x144] ss:$8 sps:$4 sm:$0xff]   ;;  %v1020_v28 = vld [vmem:[%s1173_s21 + $0x40] ss:$8 sps:$4 sm:$0xff]  }
  0x14   : > { %v278_v16 = vcombine.high %v1176_v11, %v1176_v11  ;;  %v279_v17 = vcombine.high %v1178_v12, %v1178_v12  ;;  %v1024_v29 = vld [vmem:[%s1173_s21 + $0x34] ss:$8 sps:$4 sm:$0xff]   ;;  %v1023_v30 = vld [vmem:[%s1173_s21 + $0x140] ss:$8 sps:$4 sm:$0xff]   ;;  %v1026_v32 = vld [vmem:[%s1173_s21 + $0x30] ss:$8 sps:$4 sm:$0xff]  }
  0x15   : > { %712 = vmatpush1.bf16.msra.mxu0 %v1008_v19  ;;  %v1027_v31 = vld [vmem:[%s1173_s21 + $0x134] ss:$8 sps:$4 sm:$0xff]   ;;  %v1030_v33 = vld [vmem:[%s1173_s21 + $0x24] ss:$8 sps:$4 sm:$0xff]   ;;  %v1029_v34 = vld [vmem:[%s1173_s21 + $0x130] ss:$8 sps:$4 sm:$0xff]  }
  0x16   : > { %741 = vmatprep.mubr.bf16.mxu0 %v278_v16  ;;  %782 = vmatprep.mubr.bf16.mxu1 %v279_v17  ;;  %v1033_v35 = vld [vmem:[%s1173_s21 + $0x124] ss:$8 sps:$4 sm:$0xff]   ;;  %v1032_v36 = vld [vmem:[%s1173_s21 + $0x20] ss:$8 sps:$4 sm:$0xff]   ;;  %v1036_v37 = vld [vmem:[%s1173_s21 + $0x14] ss:$8 sps:$4 sm:$0xff]  }
  0x17   : > { %713 = vmatprep.subr.bf16.mxu0 %v1012_v22  ;;  %753 = vmatpush1.bf16.msra.mxu1 %v1011_v21  ;;  %v1035_v38 = vld [vmem:[%s1173_s21 + $0x120] ss:$8 sps:$4 sm:$0xff]   ;;  %v1039_v39 = vld [vmem:[%s1173_s21 + $0x114] ss:$8 sps:$4 sm:$0xff]   ;;  %v1038_v40 = vld [vmem:[%s1173_s21 + $0x10] ss:$8 sps:$4 sm:$0xff]  }
  0x18   : > { %754 = vmatprep.subr.bf16.mxu1 %v1015_v24  ;;  %v1042_v41 = vld [vmem:[%s1173_s21 + $0x4] ss:$8 sps:$4 sm:$0xff]   ;;  %v1041_v42 = vld [vmem:[%s1173_s21 + $0x110] ss:$8 sps:$4 sm:$0xff]   ;;  %v1044_v44 = vld [vmem:[%s1173_s21] ss:$8 sps:$4 sm:$0xff]  }
  0x19   : > { %714 = vmatpush1.bf16.msra.mxu0 %v1014_v23  ;;  %v1045_v43 = vld [vmem:[%s1173_s21 + $0x104] ss:$8 sps:$4 sm:$0xff]   ;;  %v1048_v45 = vld [vmem:[%s1173_s21 + $0xf4] ss:$8 sps:$4 sm:$0xff]   ;;  %v1047_v46 = vld [vmem:[%s1173_s21 + $0x100] ss:$8 sps:$4 sm:$0xff]  }
  0x1a   : > { %715 = vmatprep.subr.bf16.mxu0 %v1018_v25  ;;  %v1051_v47 = vld [vmem:[%s1173_s21 + $0x1f4] ss:$8 sps:$4 sm:$0xff]   ;;  %v1050_v48 = vld [vmem:[%s1173_s21 + $0xf0] ss:$8 sps:$4 sm:$0xff]   ;;  %v1054_v49 = vld [vmem:[%s1173_s21 + $0xe4] ss:$8 sps:$4 sm:$0xff]  }
  0x1b   : > { %755 = vmatpush1.bf16.msra.mxu1 %v1017_v26  ;;  %v1053_v50 = vld [vmem:[%s1173_s21 + $0x1f0] ss:$8 sps:$4 sm:$0xff]   ;;  %v1057_v51 = vld [vmem:[%s1173_s21 + $0x1e4] ss:$8 sps:$4 sm:$0xff]   ;;  %v1056_v52 = vld [vmem:[%s1173_s21 + $0xe0] ss:$8 sps:$4 sm:$0xff]  }
  0x1c   : > { %756 = vmatprep.subr.bf16.mxu1 %v1021_v27  ;;  %v1060_v53 = vld [vmem:[%s1173_s21 + $0xd4] ss:$8 sps:$4 sm:$0xff]   ;;  %v1059_v54 = vld [vmem:[%s1173_s21 + $0x1e0] ss:$8 sps:$4 sm:$0xff]   ;;  %v1062_v56 = vld [vmem:[%s1173_s21 + $0xd0] ss:$8 sps:$4 sm:$0xff]  }
  0x1d   : > { %716 = vmatpush1.bf16.msra.mxu0 %v1020_v28  ;;  %v1063_v55 = vld [vmem:[%s1173_s21 + $0x1d4] ss:$8 sps:$4 sm:$0xff]   ;;  %v1066_v57 = vld [vmem:[%s1173_s21 + $0xc4] ss:$8 sps:$4 sm:$0xff]   ;;  %v1065_v58 = vld [vmem:[%s1173_s21 + $0x1d0] ss:$8 sps:$4 sm:$0xff]  }
  0x1e   : > { %717 = vmatprep.subr.bf16.mxu0 %v1024_v29  ;;  %v1069_v59 = vld [vmem:[%s1173_s21 + $0x1c4] ss:$8 sps:$4 sm:$0xff]   ;;  %v1068_v60 = vld [vmem:[%s1173_s21 + $0xc0] ss:$8 sps:$4 sm:$0xff]   ;;  %v1072_v61 = vld [vmem:[%s1173_s21 + $0xb4] ss:$8 sps:$4 sm:$0xff]  }
  0x1f   : > { %757 = vmatpush1.bf16.msra.mxu1 %v1023_v30  ;;  %v1071_v62 = vld [vmem:[%s1173_s21 + $0x1c0] ss:$8 sps:$4 sm:$0xff]   ;;  %v1075_v63 = vld [vmem:[%s1173_s21 + $0x1b4] ss:$8 sps:$4 sm:$0xff]   ;;  %v1074_v0 = vld [vmem:[%s1173_s21 + $0xb0] ss:$8 sps:$4 sm:$0xff]  }
  0x20   : > { %758 = vmatprep.subr.bf16.mxu1 %v1027_v31  ;;  %v1078_v1 = vld [vmem:[%s1173_s21 + $0xa4] ss:$8 sps:$4 sm:$0xff]   ;;  %v1077_v2 = vld [vmem:[%s1173_s21 + $0x1b0] ss:$8 sps:$4 sm:$0xff]   ;;  %v1080_v4 = vld [vmem:[%s1173_s21 + $0xa0] ss:$8 sps:$4 sm:$0xff]  }
  0x21   : > { %718 = vmatpush1.bf16.msra.mxu0 %v1026_v32  ;;  %v1081_v3 = vld [vmem:[%s1173_s21 + $0x1a4] ss:$8 sps:$4 sm:$0xff]   ;;  %v1084_v5 = vld [vmem:[%s1173_s21 + $0x94] ss:$8 sps:$4 sm:$0xff]   ;;  %v1083_v6 = vld [vmem:[%s1173_s21 + $0x1a0] ss:$8 sps:$4 sm:$0xff]  }
  0x22   : > { %719 = vmatprep.subr.bf16.mxu0 %v1030_v33  ;;  %v1087_v7 = vld [vmem:[%s1173_s21 + $0x194] ss:$8 sps:$4 sm:$0xff]   ;;  %v1086_v8 = vld [vmem:[%s1173_s21 + $0x90] ss:$8 sps:$4 sm:$0xff]   ;;  %v1090_v9 = vld [vmem:[%s1173_s21 + $0x84] ss:$8 sps:$4 sm:$0xff]  }
  0x23   : > { %759 = vmatpush1.bf16.msra.mxu1 %v1029_v34  ;;  %v1089_v10 = vld [vmem:[%s1173_s21 + $0x190] ss:$8 sps:$4 sm:$0xff]   ;;  %v1093_v13 = vld [vmem:[%s1173_s21 + $0x184] ss:$8 sps:$4 sm:$0xff]   ;;  %v1092_v14 = vld [vmem:[%s1173_s21 + $0x80] ss:$8 sps:$4 sm:$0xff]  }
  0x24   : > { %760 = vmatprep.subr.bf16.mxu1 %v1033_v35  ;;  %v1098_v15 = vld [vmem:[%s1173_s21 + $0x274] ss:$8 sps:$4 sm:$0xff]   ;;  %v900_v16 = vld.sshfl [vmem:[%s1277_s1 + $0x8] sm:$0x33 pattern:$0x76325410] }
  0x25   : > { %720 = vmatpush1.bf16.msra.mxu0 %v1032_v36  ;;  %v1095_v17 = vld [vmem:[%s1173_s21 + $0x180] ss:$8 sps:$4 sm:$0xff]   ;;  %v1096_v18 = vld [vmem:[%s1173_s21 + $0x270] ss:$8 sps:$4 sm:$0xff]   ;;  %v287_v19 = vcombine.high %v900_v16, %v900_v16  ;;  %v1102_v20 = vld [vmem:[%s1173_s21 + $0x264] ss:$8 sps:$4 sm:$0xff]  }
  0x26   : > { %721 = vmatprep.subr.bf16.mxu0 %v1036_v37  ;;  %v1100_v21 = vld [vmem:[%s1173_s21 + $0x260] ss:$8 sps:$4 sm:$0xff]   ;;  %v1105_v22 = vld [vmem:[%s1173_s21 + $0x254] ss:$8 sps:$4 sm:$0xff]   ;;  %v1103_v23 = vld [vmem:[%s1173_s21 + $0x250] ss:$8 sps:$4 sm:$0xff]  }
  0x27   : > { %761 = vmatpush1.bf16.msra.mxu1 %v1035_v38  ;;  %v1108_v24 = vld [vmem:[%s1173_s21 + $0x244] ss:$8 sps:$4 sm:$0xff]   ;;  %v1111_v25 = vld [vmem:[%s1173_s21 + $0x234] ss:$8 sps:$4 sm:$0xff]   ;;  %v1109_v26 = vld [vmem:[%s1173_s21 + $0x230] ss:$8 sps:$4 sm:$0xff]  }
  0x28   : > { %762 = vmatprep.subr.bf16.mxu1 %v1039_v39  ;;  %v1112_v27 = vld [vmem:[%s1173_s21 + $0x220] ss:$8 sps:$4 sm:$0xff]   ;;  %v1117_v28 = vld [vmem:[%s1173_s21 + $0x214] ss:$8 sps:$4 sm:$0xff]   ;;  %v1115_v29 = vld [vmem:[%s1173_s21 + $0x210] ss:$8 sps:$4 sm:$0xff]  }
  0x29   : > { %722 = vmatpush1.bf16.msra.mxu0 %v1038_v40  ;;  %v1120_v30 = vld [vmem:[%s1173_s21 + $0x204] ss:$8 sps:$4 sm:$0xff]   ;;  %v1118_v32 = vld [vmem:[%s1173_s21 + $0x200] ss:$8 sps:$4 sm:$0xff]  }
  0x2a   : > { %723 = vmatprep.subr.bf16.mxu0 %v1042_v41  ;;  %v254_v31 = vld [vmem:[%s1173_s21 + $0x280] sm:$0xff] }
  0x2b   : > { %763 = vmatpush1.bf16.msra.mxu1 %v1041_v42  ;;  %v982_v33 = vcombine.high %v254_v31, %v254_v31  ;;  %v981_v34 = vcombine.low %v254_v31, %v254_v31 }
  0x2c   : > { %764 = vmatprep.subr.bf16.mxu1 %v1045_v43 }
  0x2d   : > { %724 = vmatpush1.bf16.msra.mxu0 %v1044_v44  ;;  %v704_v35 = vsel %vm702_vm1, %v981_v34, 0 }
  0x2e   : > { %725 = vmatprep.subr.bf16.mxu0 %v1048_v45 }
  0x2f   : > { %765 = vmatpush1.bf16.msra.mxu1 %v1047_v46 }
  0x30   : > { %766 = vmatprep.subr.bf16.mxu1 %v1051_v47 }
  0x31   : > { %726 = vmatpush2.bf16.msra.mxu0 %v1050_v48 }
  0x32   : > { %727 = vmatprep.subr.bf16.mxu0 %v1054_v49 }
  0x33   : > { %767 = vmatpush2.bf16.msra.mxu1 %v1053_v50 }
  0x34   : > { %768 = vmatprep.subr.bf16.mxu1 %v1057_v51 }
  0x35   : > { %728 = vmatpush2.bf16.msra.mxu0 %v1056_v52 }
  0x36   : > { %729 = vmatprep.subr.bf16.mxu0 %v1060_v53 }
  0x37   : > { %769 = vmatpush2.bf16.msra.mxu1 %v1059_v54 }
  0x38   : > { %770 = vmatprep.subr.bf16.mxu1 %v1063_v55 }
  0x39   : > { %730 = vmatpush2.bf16.msra.mxu0 %v1062_v56 }
  0x3a   : > { %731 = vmatprep.subr.bf16.mxu0 %v1066_v57 }
  0x3b   : > { %771 = vmatpush2.bf16.msra.mxu1 %v1065_v58 }
  0x3c   : > { %772 = vmatprep.subr.bf16.mxu1 %v1069_v59 }
  0x3d   : > { %732 = vmatpush2.bf16.msra.mxu0 %v1068_v60 }
  0x3e   : > { %733 = vmatprep.subr.bf16.mxu0 %v1072_v61 }
  0x3f   : > { %773 = vmatpush2.bf16.msra.mxu1 %v1071_v62 }
  0x40   : > { %774 = vmatprep.subr.bf16.mxu1 %v1075_v63 }
  0x41   : > { %734 = vmatpush2.bf16.msra.mxu0 %v1074_v0 }
  0x42   : > { %735 = vmatprep.subr.bf16.mxu0 %v1078_v1 }
  0x43   : > { %775 = vmatpush2.bf16.msra.mxu1 %v1077_v2 }
  0x44   : > { %776 = vmatprep.subr.bf16.mxu1 %v1081_v3 }
  0x45   : > { %736 = vmatpush2.bf16.msra.mxu0 %v1080_v4 }
  0x46   : > { %737 = vmatprep.subr.bf16.mxu0 %v1084_v5 }
  0x47   : > { %777 = vmatpush2.bf16.msra.mxu1 %v1083_v6 }
  0x48   : > { %778 = vmatprep.subr.bf16.mxu1 %v1087_v7 }
  0x49   : > { %738 = vmatpush2.bf16.msra.mxu0 %v1086_v8 }
  0x4a   : > { %739 = vmatprep.subr.bf16.mxu0 %v1090_v9 }
  0x4b   : > { %779 = vmatpush2.bf16.msra.mxu1 %v1089_v10 }
  0x4c   : > { %780 = vmatprep.subr.bf16.mxu1 %v1093_v13 }
  0x4d   : > { %740 = vmatpush2.bf16.msra.mxu0 %v1092_v14 }
  0x4e   : > { %791 = vmatprep.subr.bf16.mxu0 %v1098_v15 }
  0x4f   : > { %781 = vmatpush2.bf16.msra.mxu1 %v1095_v17 }
  0x50   : > { %742 = vmatmul.mubr.bf16.vlgmr.msra.gmra.mxu0 %v1176_v11  ;;  %v1106_v11 = vld [vmem:[%s1173_s21 + $0x240] ss:$8 sps:$4 sm:$0xff]  }
  0x51   : > { %792 = vmatpush1.bf16.msra.mxu0 %v1096_v18  ;;  %984 = vmatprep.mubr.msk.bf16.mxu0 %vm698_vm0, %v287_v19 }
  0x52   : > { %783 = vmatmul.mubr.bf16.vlgmr.msra.gmra.mxu1 %v1178_v12  ;;  %793 = vmatprep.subr.bf16.mxu0 %v1102_v20  ;;  %v1114_v12 = vld [vmem:[%s1173_s21 + $0x224] ss:$8 sps:$4 sm:$0xff]  }
  0x55   : > { %794 = vmatpush1.bf16.msra.mxu0 %v1100_v21 }
  0x56   : > { %795 = vmatprep.subr.bf16.mxu0 %v1105_v22 }
  0x59   : > { %796 = vmatpush1.bf16.msra.mxu0 %v1103_v23 }
  0x5a   : > { %797 = vmatprep.subr.bf16.mxu0 %v1108_v24 }
  0x5d   : > { %798 = vmatpush1.bf16.msra.mxu0 %v1106_v11 }
  0x5e   : > { %799 = vmatprep.subr.bf16.mxu0 %v1111_v25 }
  0x61   : > { %800 = vmatpush1.bf16.msra.mxu0 %v1109_v26 }
  0x62   : > { %801 = vmatprep.subr.bf16.mxu0 %v1114_v12 }
  0x65   : > { %802 = vmatpush1.bf16.msra.mxu0 %v1112_v27 }
  0x66   : > { %803 = vmatprep.subr.bf16.mxu0 %v1117_v28 }
  0x69   : > { %804 = vmatpush1.bf16.msra.mxu0 %v1115_v29 }
  0x6a   : > { %805 = vmatprep.subr.bf16.mxu0 %v1120_v30 }
  0x6d   : > { %806 = vmatpush1.bf16.msra.mxu0 %v1118_v32 }
  0x6e   : > { %983 = vmatprep.subr.msk.bf16.mxu0 %vm702_vm1, %v982_v33 }
  0x71   : > { %822 = vmatpush2.bf16.msra.mxu0 %v704_v35 }
  0x74   : > { %824 = vmatmul.mubr.bf16.vlgmr.msra.gmra.mxu0 %v900_v16 }
  0x88   : > { %v259_v44 = vpop.permute.xlu0 %258 }
 0x110   : > { %v743_v36 = vpop.f32.mrf.mxu0 }
 0x111   : > { %v744_v45 = vadd.f32 %v743_v36, %v259_v44 }
 0x112   : > { %v745_v37 = vpop.f32.mrf.mxu0  ;;  %v784_v38 = vpop.f32.mrf.mxu1 }
 0x113   : > { %v746_v46 = vadd.f32 %v745_v37, %v259_v44  ;;  %v785_v48 = vadd.f32 %v784_v38, %v744_v45 }
 0x114   : > { %v747_v39 = vpop.f32.mrf.mxu0  ;;  %v786_v40 = vpop.f32.mrf.mxu1 }
 0x115   : > { %v787_v49 = vadd.f32 %v786_v40, %v746_v46 }
 0x116   : > { %v748_v41 = vpop.f32.mrf.mxu0  ;;  %v788_v42 = vpop.f32.mrf.mxu1 }
 0x118   : > { %v789_v43 = vpop.f32.mrf.mxu1 }
 0x134   : > { %v825_v47 = vpop.f32.mrf.mxu0 }
 0x135   : > { %v826_v51 = vadd.f32 %v825_v47, %v785_v48 }
 0x136   : > { %v827_v50 = vpop.f32.mrf.mxu0 }
 0x137   : > { %v828_v52 = vadd.f32 %v827_v50, %v787_v49 }
 0x138   : > { %v829_v53 = vpop.f32.mrf.mxu0 }
 0x139   : > { %v834_v54 = vcombine.low %v826_v51, %v828_v52 }
 0x13a   : > { %v830_v55 = vpop.f32.mrf.mxu0 }
 0x13b   : > { %836 = vst [vmem:[%s170_s27] sm:$0x77] %v834_v54 }
 0x13c PF: > { %s13_s12 = sadd.s32 1, %s1129_s12  }
 0x13d   : > { %p10_p4 = scmp.ge.s32.totalorder %s13_s12, 4  }
 0x13f   :  { %12 = sbr.rel (!%p10_p4) target bundleno = 1 (0x1), region = 62 }

</bundles_post_ra>
